<compile_context>
chip_gen: v6e
topology: v6e:2x2x1
jax: 0.10.0
libtpu: 0.0.40
codegen_flags: <defaults>
</compile_context>

<pallas_src>
import functools

import jax
import jax.numpy as jnp
import numpy as np
from jax import lax
from jax.experimental import pallas as pl
from jax.experimental.pallas import tpu as pltpu

HIDDEN_SIZE = 48
INPUT_SIZE = 4
NUM_CLASSES = 10
NUM_LAYERS = 1      # single-layer GRU, as in the PyTorch module
GATE = 128          # each GRU gate padded to its own 128-lane slot
OUT_PAD = 128       # FC output padded to a full lane slot (unmasked store)


def gru_fc_kernel(x_ref,                 # (T*Bp, I)    time-major, batch-padded input
                  wx_ref,                # (I, 3*G)     fused input weights, gate g at cols [g*G, g*G+H)
                  wh_ref,                # (G, 3*G)     fused hidden weights (rows >= H are zero)
                  bi_ref,                # (1, 3*G)     fused biases: r:(b_ir+b_hr), z:(b_iz+b_hz), n:b_in
                  bhn_ref,               # (1, G)       b_hn (scaled by r inside the cell)
                  wfc_ref,               # (G, OUT_PAD) fc weight^T, zero-padded rows/cols
                  bfc_ref,               # (1, OUT_PAD)
                  out_ref,               # (Bp, OUT_PAD) lane-dense output slab
                  xp_ref,                # VMEM scratch (T*Bp, 3*G): hoisted input projections
                  *, seq_len, batch_pad):
    T, B, G = seq_len, batch_pad, GATE

    # ---- hoisted input projection for ALL timesteps (independent of h) ----
    # One batched MXU matmul + bias add; padded gate lanes stay exactly zero
    # because the padded weight/bias columns are zero.
    xp_ref[...] = (
        jnp.dot(x_ref[...], wx_ref[...], preferred_element_type=jnp.float32)
        + bi_ref[...])

    # ---- hoist weight load and bias broadcast out of the recurrence ----
    wh = wh_ref[...]                                   # (G, 3G)
    bhn = jnp.broadcast_to(bhn_ref[...], (B, G))       # (B, G), one vreg at Bp=8

    # ---- recurrence: fully unrolled (T static). Per step: one MXU matmul,
    # ---- EUP sigmoid/tanh, a handful of full-vreg VPU ops. ----
    h = jnp.zeros((B, G), jnp.float32)                 # padded lanes stay 0 (invariant)
    for t in range(T):
        xp_t = xp_ref[pl.ds(t * B, B), :]              # (B, 3G); static start, multiple of 8
        hh = jnp.dot(h, wh, preferred_element_type=jnp.float32)        # (B, 3G)
        r = jax.nn.sigmoid(xp_t[:, 0:G] + hh[:, 0:G])
        z = jax.nn.sigmoid(xp_t[:, G:2 * G] + hh[:, G:2 * G])
        n = jnp.tanh(xp_t[:, 2 * G:3 * G] + r * (hh[:, 2 * G:3 * G] + bhn))
        h = n + z * (h - n)                            # == (1 - z) * n + z * h

    # ---- final FC on the last hidden state only (lane-dense, unmasked store) ----
    out_ref[...] = (
        jnp.dot(h, wfc_ref[...], preferred_element_type=jnp.float32)
        + bfc_ref[...]).astype(out_ref.dtype)


def rnn_forward(x, kparams):
    """x: (B, T, I) batch_first, like the PyTorch module. Returns (B, num_classes)."""
    B, T, I = x.shape
    C = NUM_CLASSES
    wx, wh, bi, bhn, wfc, bfc = kparams

    # Wrapper-side layout plumbing: time-major, batch padded to a sublane
    # multiple (8) so every in-kernel row slice is tile aligned.
    B_pad = max(8, ((B + 7) // 8) * 8)
    x_tm = jnp.transpose(x, (1, 0, 2)).astype(jnp.float32)   # (T, B, I)
    if B_pad != B:
        x_tm = jnp.pad(x_tm, ((0, 0), (0, B_pad - B), (0, 0)))
    x2d = x_tm.reshape(T * B_pad, I)

    kernel = functools.partial(gru_fc_kernel, seq_len=T, batch_pad=B_pad)
    vmem = pl.BlockSpec(memory_space=pltpu.MemorySpace.VMEM)

    out = pl.pallas_call(
        kernel,
        out_shape=jax.ShapeDtypeStruct((B_pad, OUT_PAD), jnp.float32),
        in_specs=[vmem] * 7,
        out_specs=vmem,
        scratch_shapes=[pltpu.VMEM((T * B_pad, 3 * GATE), jnp.float32)],
    )(x2d, wx, wh, bi, bhn, wfc, bfc)
    return out[:B, :C]


def init_params(key):
    """Raw PyTorch-layout GRU/FC params, uniform(-1/sqrt(H), 1/sqrt(H))."""
    H, I, C = HIDDEN_SIZE, INPUT_SIZE, NUM_CLASSES
    k = 1.0 / np.sqrt(H)
    keys = jax.random.split(key, 6)
    u = lambda kk, shape: jax.random.uniform(kk, shape, jnp.float32, -k, k)
    w_ih = u(keys[0], (3 * H, I))   # gate order [r, z, n], like PyTorch
    w_hh = u(keys[1], (3 * H, H))
    b_ih = u(keys[2], (3 * H,))
    b_hh = u(keys[3], (3 * H,))
    w_fc = u(keys[4], (C, H))
    b_fc = u(keys[5], (C,))
    return (w_ih, w_hh, b_ih, b_hh, w_fc, b_fc)


def prepare_params(raw):
    """Fuse + pad the raw params into the lane-dense kernel layout."""
    w_ih, w_hh, b_ih, b_hh, w_fc, b_fc = (np.asarray(p, np.float32) for p in raw)
    H, I, C, G = HIDDEN_SIZE, INPUT_SIZE, NUM_CLASSES, GATE

    wx = np.zeros((I, 3 * G), np.float32)
    wh = np.zeros((G, 3 * G), np.float32)
    bi = np.zeros((1, 3 * G), np.float32)
    for g in range(3):                                   # gates [r, z, n]
        lo, hi = g * H, (g + 1) * H
        wx[:, g * G:g * G + H] = w_ih[lo:hi].T           # (I, H) into its 128-lane slot
        wh[:H, g * G:g * G + H] = w_hh[lo:hi].T          # (H, H) into its 128-lane slot
    bi[0, 0:H] = b_ih[0:H] + b_hh[0:H]                   # r: b_ir + b_hr (purely additive)
    bi[0, G:G + H] = b_ih[H:2 * H] + b_hh[H:2 * H]       # z: b_iz + b_hz
    bi[0, 2 * G:2 * G + H] = b_ih[2 * H:3 * H]           # n: b_in only
    bhn = np.zeros((1, G), np.float32)
    bhn[0, :H] = b_hh[2 * H:3 * H]                       # b_hn, scaled by r in-kernel

    wfc = np.zeros((G, OUT_PAD), np.float32)             # lane-dense FC output slab
    wfc[:H, :C] = w_fc.T
    bfc = np.zeros((1, OUT_PAD), np.float32)
    bfc[0, :C] = b_fc

    return tuple(jnp.asarray(a) for a in (wx, wh, bi, bhn, wfc, bfc))


def rnn_forward_ref(x, raw):
    """Pure-JAX reference (lax.scan GRU + FC), PyTorch semantics, unpadded."""
    w_ih, w_hh, b_ih, b_hh, w_fc, b_fc = raw
    H = HIDDEN_SIZE
    B = x.shape[0]
    h0 = jnp.zeros((B, H), jnp.float32)

    def step(h, x_t):
        gi = x_t @ w_ih.T + b_ih
        gh = h @ w_hh.T + b_hh
        r = jax.nn.sigmoid(gi[:, :H] + gh[:, :H])
        z = jax.nn.sigmoid(gi[:, H:2 * H] + gh[:, H:2 * H])
        n = jnp.tanh(gi[:, 2 * H:] + r * gh[:, 2 * H:])
        return (1.0 - z) * n + z * h, None

    h_last, _ = lax.scan(step, h0, jnp.transpose(x, (1, 0, 2)))
    return h_last @ w_fc.T + b_fc


if __name__ == "__main__":
    key = jax.random.PRNGKey(0)
    k_x, k_p = jax.random.split(key)

    B, T = 4, 8  # small batch, short sequence; input feature size fixed to 4
    x = jax.random.normal(k_x, (B, T, INPUT_SIZE), jnp.float32)
    raw = init_params(k_p)
    kparams = prepare_params(raw)

    out = jax.block_until_ready(rnn_forward(x, kparams))
    ref = jax.block_until_ready(rnn_forward_ref(x, raw))

    assert out.shape == (B, NUM_CLASSES)
    np.testing.assert_allclose(np.asarray(out), np.asarray(ref), rtol=2e-4, atol=2e-4)

    print("KERNEL_OK")
</pallas_src>

<mosaic_0001>
module attributes {stable_mosaic.version = 11 : i64} {
  func.func @gru_fc_kernel(%arg0: memref<64x4xf32, #tpu.memory_space<vmem>>, %arg1: memref<4x384xf32, #tpu.memory_space<vmem>>, %arg2: memref<128x384xf32, #tpu.memory_space<vmem>>, %arg3: memref<1x384xf32, #tpu.memory_space<vmem>>, %arg4: memref<1x128xf32, #tpu.memory_space<vmem>>, %arg5: memref<128x128xf32, #tpu.memory_space<vmem>>, %arg6: memref<1x128xf32, #tpu.memory_space<vmem>>, %arg7: memref<8x128xf32, #tpu.memory_space<vmem>>, %arg8: memref<64x384xf32, #tpu.memory_space<vmem>>) attributes {dimension_semantics = [], scalar_prefetch = 0 : i64, scratch_operands = 1 : i64, tpu.core_type = #tpu.core_type<tc>} {
    %c0 = arith.constant 0 : index
    %c0_0 = arith.constant 0 : index
    %0 = vector.load %arg0[%c0, %c0_0] : memref<64x4xf32, #tpu.memory_space<vmem>>, vector<64x4xf32>
    %c0_1 = arith.constant 0 : index
    %c0_2 = arith.constant 0 : index
    %1 = vector.load %arg1[%c0_1, %c0_2] : memref<4x384xf32, #tpu.memory_space<vmem>>, vector<4x384xf32>
    %cst = arith.constant dense<0.000000e+00> : vector<64x384xf32>
    %2 = tpu.matmul %0, %1, %cst {dimension_numbers = #tpu.dot_dimension_numbers<[1], [0], [0], [1], [0, 0, 1, 1], [], []>} : vector<64x4xf32>, vector<4x384xf32>, vector<64x384xf32> -> vector<64x384xf32>
    %c0_3 = arith.constant 0 : index
    %c0_4 = arith.constant 0 : index
    %3 = vector.load %arg3[%c0_3, %c0_4] : memref<1x384xf32, #tpu.memory_space<vmem>>, vector<1x384xf32>
    %4 = vector.broadcast %3 : vector<1x384xf32> to vector<64x384xf32>
    %5 = arith.addf %2, %4 : vector<64x384xf32>
    %c0_5 = arith.constant 0 : index
    %c0_6 = arith.constant 0 : index
    %6 = vector.load %arg8[%c0_5, %c0_6] : memref<64x384xf32, #tpu.memory_space<vmem>>, vector<64x384xf32>
    tpu.vector_store %arg8[%c0_5, %c0_6], %5 {strides = array<i32>} : memref<64x384xf32, #tpu.memory_space<vmem>>, vector<64x384xf32>,
    %c0_7 = arith.constant 0 : index
    %c0_8 = arith.constant 0 : index
    %7 = vector.load %arg2[%c0_7, %c0_8] : memref<128x384xf32, #tpu.memory_space<vmem>>, vector<128x384xf32>
    %c0_9 = arith.constant 0 : index
    %c0_10 = arith.constant 0 : index
    %8 = vector.load %arg4[%c0_9, %c0_10] : memref<1x128xf32, #tpu.memory_space<vmem>>, vector<1x128xf32>
    %9 = vector.shape_cast %8 : vector<1x128xf32> to vector<1x128xf32>
    %10 = vector.broadcast %9 : vector<1x128xf32> to vector<8x128xf32>
    %cst_11 = arith.constant 0.000000e+00 : f32
    %11 = vector.broadcast %cst_11 : f32 to vector<8x128xf32>
    %c0_12 = arith.constant 0 : index
    %c0_13 = arith.constant 0 : index
    %12 = vector.load %arg8[%c0_12, %c0_13] : memref<64x384xf32, #tpu.memory_space<vmem>>, vector<8x384xf32>
    %cst_14 = arith.constant dense<0.000000e+00> : vector<8x384xf32>
    %13 = tpu.matmul %11, %7, %cst_14 {dimension_numbers = #tpu.dot_dimension_numbers<[1], [0], [0], [1], [0, 0, 1, 1], [], []>} : vector<8x128xf32>, vector<128x384xf32>, vector<8x384xf32> -> vector<8x384xf32>
    %14 = vector.extract_strided_slice %12 {offsets = [0, 0], sizes = [8, 128], strides = [1, 1]} : vector<8x384xf32> to vector<8x128xf32>
    %15 = vector.extract_strided_slice %13 {offsets = [0, 0], sizes = [8, 128], strides = [1, 1]} : vector<8x384xf32> to vector<8x128xf32>
    %16 = arith.addf %14, %15 : vector<8x128xf32>
    %17 = arith.negf %16 : vector<8x128xf32>
    %18 = math.exp %17 : vector<8x128xf32>
    %cst_15 = arith.constant 1.000000e+00 : f32
    %19 = vector.broadcast %cst_15 : f32 to vector<8x128xf32>
    %20 = arith.addf %19, %18 : vector<8x128xf32>
    %21 = arith.divf %19, %20 : vector<8x128xf32>
    %22 = vector.extract_strided_slice %12 {offsets = [0, 128], sizes = [8, 128], strides = [1, 1]} : vector<8x384xf32> to vector<8x128xf32>
    %23 = vector.extract_strided_slice %13 {offsets = [0, 128], sizes = [8, 128], strides = [1, 1]} : vector<8x384xf32> to vector<8x128xf32>
    %24 = arith.addf %22, %23 : vector<8x128xf32>
    %25 = arith.negf %24 : vector<8x128xf32>
    %26 = math.exp %25 : vector<8x128xf32>
    %cst_16 = arith.constant 1.000000e+00 : f32
    %27 = vector.broadcast %cst_16 : f32 to vector<8x128xf32>
    %28 = arith.addf %27, %26 : vector<8x128xf32>
    %29 = arith.divf %27, %28 : vector<8x128xf32>
    %30 = vector.extract_strided_slice %12 {offsets = [0, 256], sizes = [8, 128], strides = [1, 1]} : vector<8x384xf32> to vector<8x128xf32>
    %31 = vector.extract_strided_slice %13 {offsets = [0, 256], sizes = [8, 128], strides = [1, 1]} : vector<8x384xf32> to vector<8x128xf32>
    %32 = arith.addf %31, %10 : vector<8x128xf32>
    %33 = arith.mulf %21, %32 : vector<8x128xf32>
    %34 = arith.addf %30, %33 : vector<8x128xf32>
    %35 = math.tanh %34 : vector<8x128xf32>
    %36 = arith.subf %11, %35 : vector<8x128xf32>
    %37 = arith.mulf %29, %36 : vector<8x128xf32>
    %38 = arith.addf %35, %37 : vector<8x128xf32>
    %c8 = arith.constant 8 : index
    %c0_17 = arith.constant 0 : index
    %39 = vector.load %arg8[%c8, %c0_17] : memref<64x384xf32, #tpu.memory_space<vmem>>, vector<8x384xf32>
    %cst_18 = arith.constant dense<0.000000e+00> : vector<8x384xf32>
    %40 = tpu.matmul %38, %7, %cst_18 {dimension_numbers = #tpu.dot_dimension_numbers<[1], [0], [0], [1], [0, 0, 1, 1], [], []>} : vector<8x128xf32>, vector<128x384xf32>, vector<8x384xf32> -> vector<8x384xf32>
    %41 = vector.extract_strided_slice %39 {offsets = [0, 0], sizes = [8, 128], strides = [1, 1]} : vector<8x384xf32> to vector<8x128xf32>
    %42 = vector.extract_strided_slice %40 {offsets = [0, 0], sizes = [8, 128], strides = [1, 1]} : vector<8x384xf32> to vector<8x128xf32>
    %43 = arith.addf %41, %42 : vector<8x128xf32>
    %44 = arith.negf %43 : vector<8x128xf32>
    %45 = math.exp %44 : vector<8x128xf32>
    %cst_19 = arith.constant 1.000000e+00 : f32
    %46 = vector.broadcast %cst_19 : f32 to vector<8x128xf32>
    %47 = arith.addf %46, %45 : vector<8x128xf32>
    %48 = arith.divf %46, %47 : vector<8x128xf32>
    %49 = vector.extract_strided_slice %39 {offsets = [0, 128], sizes = [8, 128], strides = [1, 1]} : vector<8x384xf32> to vector<8x128xf32>
    %50 = vector.extract_strided_slice %40 {offsets = [0, 128], sizes = [8, 128], strides = [1, 1]} : vector<8x384xf32> to vector<8x128xf32>
    %51 = arith.addf %49, %50 : vector<8x128xf32>
    %52 = arith.negf %51 : vector<8x128xf32>
    %53 = math.exp %52 : vector<8x128xf32>
    %cst_20 = arith.constant 1.000000e+00 : f32
    %54 = vector.broadcast %cst_20 : f32 to vector<8x128xf32>
    %55 = arith.addf %54, %53 : vector<8x128xf32>
    %56 = arith.divf %54, %55 : vector<8x128xf32>
    %57 = vector.extract_strided_slice %39 {offsets = [0, 256], sizes = [8, 128], strides = [1, 1]} : vector<8x384xf32> to vector<8x128xf32>
    %58 = vector.extract_strided_slice %40 {offsets = [0, 256], sizes = [8, 128], strides = [1, 1]} : vector<8x384xf32> to vector<8x128xf32>
    %59 = arith.addf %58, %10 : vector<8x128xf32>
    %60 = arith.mulf %48, %59 : vector<8x128xf32>
    %61 = arith.addf %57, %60 : vector<8x128xf32>
    %62 = math.tanh %61 : vector<8x128xf32>
    %63 = arith.subf %38, %62 : vector<8x128xf32>
    %64 = arith.mulf %56, %63 : vector<8x128xf32>
    %65 = arith.addf %62, %64 : vector<8x128xf32>
    %c16 = arith.constant 16 : index
    %c0_21 = arith.constant 0 : index
    %66 = vector.load %arg8[%c16, %c0_21] : memref<64x384xf32, #tpu.memory_space<vmem>>, vector<8x384xf32>
    %cst_22 = arith.constant dense<0.000000e+00> : vector<8x384xf32>
    %67 = tpu.matmul %65, %7, %cst_22 {dimension_numbers = #tpu.dot_dimension_numbers<[1], [0], [0], [1], [0, 0, 1, 1], [], []>} : vector<8x128xf32>, vector<128x384xf32>, vector<8x384xf32> -> vector<8x384xf32>
    %68 = vector.extract_strided_slice %66 {offsets = [0, 0], sizes = [8, 128], strides = [1, 1]} : vector<8x384xf32> to vector<8x128xf32>
    %69 = vector.extract_strided_slice %67 {offsets = [0, 0], sizes = [8, 128], strides = [1, 1]} : vector<8x384xf32> to vector<8x128xf32>
    %70 = arith.addf %68, %69 : vector<8x128xf32>
    %71 = arith.negf %70 : vector<8x128xf32>
    %72 = math.exp %71 : vector<8x128xf32>
    %cst_23 = arith.constant 1.000000e+00 : f32
    %73 = vector.broadcast %cst_23 : f32 to vector<8x128xf32>
    %74 = arith.addf %73, %72 : vector<8x128xf32>
    %75 = arith.divf %73, %74 : vector<8x128xf32>
    %76 = vector.extract_strided_slice %66 {offsets = [0, 128], sizes = [8, 128], strides = [1, 1]} : vector<8x384xf32> to vector<8x128xf32>
    %77 = vector.extract_strided_slice %67 {offsets = [0, 128], sizes = [8, 128], strides = [1, 1]} : vector<8x384xf32> to vector<8x128xf32>
    %78 = arith.addf %76, %77 : vector<8x128xf32>
    %79 = arith.negf %78 : vector<8x128xf32>
    %80 = math.exp %79 : vector<8x128xf32>
    %cst_24 = arith.constant 1.000000e+00 : f32
    %81 = vector.broadcast %cst_24 : f32 to vector<8x128xf32>
    %82 = arith.addf %81, %80 : vector<8x128xf32>
    %83 = arith.divf %81, %82 : vector<8x128xf32>
    %84 = vector.extract_strided_slice %66 {offsets = [0, 256], sizes = [8, 128], strides = [1, 1]} : vector<8x384xf32> to vector<8x128xf32>
    %85 = vector.extract_strided_slice %67 {offsets = [0, 256], sizes = [8, 128], strides = [1, 1]} : vector<8x384xf32> to vector<8x128xf32>
    %86 = arith.addf %85, %10 : vector<8x128xf32>
    %87 = arith.mulf %75, %86 : vector<8x128xf32>
    %88 = arith.addf %84, %87 : vector<8x128xf32>
    %89 = math.tanh %88 : vector<8x128xf32>
    %90 = arith.subf %65, %89 : vector<8x128xf32>
    %91 = arith.mulf %83, %90 : vector<8x128xf32>
    %92 = arith.addf %89, %91 : vector<8x128xf32>
    %c24 = arith.constant 24 : index
    %c0_25 = arith.constant 0 : index
    %93 = vector.load %arg8[%c24, %c0_25] : memref<64x384xf32, #tpu.memory_space<vmem>>, vector<8x384xf32>
    %cst_26 = arith.constant dense<0.000000e+00> : vector<8x384xf32>
    %94 = tpu.matmul %92, %7, %cst_26 {dimension_numbers = #tpu.dot_dimension_numbers<[1], [0], [0], [1], [0, 0, 1, 1], [], []>} : vector<8x128xf32>, vector<128x384xf32>, vector<8x384xf32> -> vector<8x384xf32>
    %95 = vector.extract_strided_slice %93 {offsets = [0, 0], sizes = [8, 128], strides = [1, 1]} : vector<8x384xf32> to vector<8x128xf32>
    %96 = vector.extract_strided_slice %94 {offsets = [0, 0], sizes = [8, 128], strides = [1, 1]} : vector<8x384xf32> to vector<8x128xf32>
    %97 = arith.addf %95, %96 : vector<8x128xf32>
    %98 = arith.negf %97 : vector<8x128xf32>
    %99 = math.exp %98 : vector<8x128xf32>
    %cst_27 = arith.constant 1.000000e+00 : f32
    %100 = vector.broadcast %cst_27 : f32 to vector<8x128xf32>
    %101 = arith.addf %100, %99 : vector<8x128xf32>
    %102 = arith.divf %100, %101 : vector<8x128xf32>
    %103 = vector.extract_strided_slice %93 {offsets = [0, 128], sizes = [8, 128], strides = [1, 1]} : vector<8x384xf32> to vector<8x128xf32>
    %104 = vector.extract_strided_slice %94 {offsets = [0, 128], sizes = [8, 128], strides = [1, 1]} : vector<8x384xf32> to vector<8x128xf32>
    %105 = arith.addf %103, %104 : vector<8x128xf32>
    %106 = arith.negf %105 : vector<8x128xf32>
    %107 = math.exp %106 : vector<8x128xf32>
    %cst_28 = arith.constant 1.000000e+00 : f32
    %108 = vector.broadcast %cst_28 : f32 to vector<8x128xf32>
    %109 = arith.addf %108, %107 : vector<8x128xf32>
    %110 = arith.divf %108, %109 : vector<8x128xf32>
    %111 = vector.extract_strided_slice %93 {offsets = [0, 256], sizes = [8, 128], strides = [1, 1]} : vector<8x384xf32> to vector<8x128xf32>
    %112 = vector.extract_strided_slice %94 {offsets = [0, 256], sizes = [8, 128], strides = [1, 1]} : vector<8x384xf32> to vector<8x128xf32>
    %113 = arith.addf %112, %10 : vector<8x128xf32>
    %114 = arith.mulf %102, %113 : vector<8x128xf32>
    %115 = arith.addf %111, %114 : vector<8x128xf32>
    %116 = math.tanh %115 : vector<8x128xf32>
    %117 = arith.subf %92, %116 : vector<8x128xf32>
    %118 = arith.mulf %110, %117 : vector<8x128xf32>
    %119 = arith.addf %116, %118 : vector<8x128xf32>
    %c32 = arith.constant 32 : index
    %c0_29 = arith.constant 0 : index
    %120 = vector.load %arg8[%c32, %c0_29] : memref<64x384xf32, #tpu.memory_space<vmem>>, vector<8x384xf32>
    %cst_30 = arith.constant dense<0.000000e+00> : vector<8x384xf32>
    %121 = tpu.matmul %119, %7, %cst_30 {dimension_numbers = #tpu.dot_dimension_numbers<[1], [0], [0], [1], [0, 0, 1, 1], [], []>} : vector<8x128xf32>, vector<128x384xf32>, vector<8x384xf32> -> vector<8x384xf32>
    %122 = vector.extract_strided_slice %120 {offsets = [0, 0], sizes = [8, 128], strides = [1, 1]} : vector<8x384xf32> to vector<8x128xf32>
    %123 = vector.extract_strided_slice %121 {offsets = [0, 0], sizes = [8, 128], strides = [1, 1]} : vector<8x384xf32> to vector<8x128xf32>
    %124 = arith.addf %122, %123 : vector<8x128xf32>
    %125 = arith.negf %124 : vector<8x128xf32>
    %126 = math.exp %125 : vector<8x128xf32>
    %cst_31 = arith.constant 1.000000e+00 : f32
    %127 = vector.broadcast %cst_31 : f32 to vector<8x128xf32>
    %128 = arith.addf %127, %126 : vector<8x128xf32>
    %129 = arith.divf %127, %128 : vector<8x128xf32>
    %130 = vector.extract_strided_slice %120 {offsets = [0, 128], sizes = [8, 128], strides = [1, 1]} : vector<8x384xf32> to vector<8x128xf32>
    %131 = vector.extract_strided_slice %121 {offsets = [0, 128], sizes = [8, 128], strides = [1, 1]} : vector<8x384xf32> to vector<8x128xf32>
    %132 = arith.addf %130, %131 : vector<8x128xf32>
    %133 = arith.negf %132 : vector<8x128xf32>
    %134 = math.exp %133 : vector<8x128xf32>
    %cst_32 = arith.constant 1.000000e+00 : f32
    %135 = vector.broadcast %cst_32 : f32 to vector<8x128xf32>
    %136 = arith.addf %135, %134 : vector<8x128xf32>
    %137 = arith.divf %135, %136 : vector<8x128xf32>
    %138 = vector.extract_strided_slice %120 {offsets = [0, 256], sizes = [8, 128], strides = [1, 1]} : vector<8x384xf32> to vector<8x128xf32>
    %139 = vector.extract_strided_slice %121 {offsets = [0, 256], sizes = [8, 128], strides = [1, 1]} : vector<8x384xf32> to vector<8x128xf32>
    %140 = arith.addf %139, %10 : vector<8x128xf32>
    %141 = arith.mulf %129, %140 : vector<8x128xf32>
    %142 = arith.addf %138, %141 : vector<8x128xf32>
    %143 = math.tanh %142 : vector<8x128xf32>
    %144 = arith.subf %119, %143 : vector<8x128xf32>
    %145 = arith.mulf %137, %144 : vector<8x128xf32>
    %146 = arith.addf %143, %145 : vector<8x128xf32>
    %c40 = arith.constant 40 : index
    %c0_33 = arith.constant 0 : index
    %147 = vector.load %arg8[%c40, %c0_33] : memref<64x384xf32, #tpu.memory_space<vmem>>, vector<8x384xf32>
    %cst_34 = arith.constant dense<0.000000e+00> : vector<8x384xf32>
    %148 = tpu.matmul %146, %7, %cst_34 {dimension_numbers = #tpu.dot_dimension_numbers<[1], [0], [0], [1], [0, 0, 1, 1], [], []>} : vector<8x128xf32>, vector<128x384xf32>, vector<8x384xf32> -> vector<8x384xf32>
    %149 = vector.extract_strided_slice %147 {offsets = [0, 0], sizes = [8, 128], strides = [1, 1]} : vector<8x384xf32> to vector<8x128xf32>
    %150 = vector.extract_strided_slice %148 {offsets = [0, 0], sizes = [8, 128], strides = [1, 1]} : vector<8x384xf32> to vector<8x128xf32>
    %151 = arith.addf %149, %150 : vector<8x128xf32>
    %152 = arith.negf %151 : vector<8x128xf32>
    %153 = math.exp %152 : vector<8x128xf32>
    %cst_35 = arith.constant 1.000000e+00 : f32
    %154 = vector.broadcast %cst_35 : f32 to vector<8x128xf32>
    %155 = arith.addf %154, %153 : vector<8x128xf32>
    %156 = arith.divf %154, %155 : vector<8x128xf32>
    %157 = vector.extract_strided_slice %147 {offsets = [0, 128], sizes = [8, 128], strides = [1, 1]} : vector<8x384xf32> to vector<8x128xf32>
    %158 = vector.extract_strided_slice %148 {offsets = [0, 128], sizes = [8, 128], strides = [1, 1]} : vector<8x384xf32> to vector<8x128xf32>
    %159 = arith.addf %157, %158 : vector<8x128xf32>
    %160 = arith.negf %159 : vector<8x128xf32>
    %161 = math.exp %160 : vector<8x128xf32>
    %cst_36 = arith.constant 1.000000e+00 : f32
    %162 = vector.broadcast %cst_36 : f32 to vector<8x128xf32>
    %163 = arith.addf %162, %161 : vector<8x128xf32>
    %164 = arith.divf %162, %163 : vector<8x128xf32>
    %165 = vector.extract_strided_slice %147 {offsets = [0, 256], sizes = [8, 128], strides = [1, 1]} : vector<8x384xf32> to vector<8x128xf32>
    %166 = vector.extract_strided_slice %148 {offsets = [0, 256], sizes = [8, 128], strides = [1, 1]} : vector<8x384xf32> to vector<8x128xf32>
    %167 = arith.addf %166, %10 : vector<8x128xf32>
    %168 = arith.mulf %156, %167 : vector<8x128xf32>
    %169 = arith.addf %165, %168 : vector<8x128xf32>
    %170 = math.tanh %169 : vector<8x128xf32>
    %171 = arith.subf %146, %170 : vector<8x128xf32>
    %172 = arith.mulf %164, %171 : vector<8x128xf32>
    %173 = arith.addf %170, %172 : vector<8x128xf32>
    %c48 = arith.constant 48 : index
    %c0_37 = arith.constant 0 : index
    %174 = vector.load %arg8[%c48, %c0_37] : memref<64x384xf32, #tpu.memory_space<vmem>>, vector<8x384xf32>
    %cst_38 = arith.constant dense<0.000000e+00> : vector<8x384xf32>
    %175 = tpu.matmul %173, %7, %cst_38 {dimension_numbers = #tpu.dot_dimension_numbers<[1], [0], [0], [1], [0, 0, 1, 1], [], []>} : vector<8x128xf32>, vector<128x384xf32>, vector<8x384xf32> -> vector<8x384xf32>
    %176 = vector.extract_strided_slice %174 {offsets = [0, 0], sizes = [8, 128], strides = [1, 1]} : vector<8x384xf32> to vector<8x128xf32>
    %177 = vector.extract_strided_slice %175 {offsets = [0, 0], sizes = [8, 128], strides = [1, 1]} : vector<8x384xf32> to vector<8x128xf32>
    %178 = arith.addf %176, %177 : vector<8x128xf32>
    %179 = arith.negf %178 : vector<8x128xf32>
    %180 = math.exp %179 : vector<8x128xf32>
    %cst_39 = arith.constant 1.000000e+00 : f32
    %181 = vector.broadcast %cst_39 : f32 to vector<8x128xf32>
    %182 = arith.addf %181, %180 : vector<8x128xf32>
    %183 = arith.divf %181, %182 : vector<8x128xf32>
    %184 = vector.extract_strided_slice %174 {offsets = [0, 128], sizes = [8, 128], strides = [1, 1]} : vector<8x384xf32> to vector<8x128xf32>
    %185 = vector.extract_strided_slice %175 {offsets = [0, 128], sizes = [8, 128], strides = [1, 1]} : vector<8x384xf32> to vector<8x128xf32>
    %186 = arith.addf %184, %185 : vector<8x128xf32>
    %187 = arith.negf %186 : vector<8x128xf32>
    %188 = math.exp %187 : vector<8x128xf32>
    %cst_40 = arith.constant 1.000000e+00 : f32
    %189 = vector.broadcast %cst_40 : f32 to vector<8x128xf32>
    %190 = arith.addf %189, %188 : vector<8x128xf32>
    %191 = arith.divf %189, %190 : vector<8x128xf32>
    %192 = vector.extract_strided_slice %174 {offsets = [0, 256], sizes = [8, 128], strides = [1, 1]} : vector<8x384xf32> to vector<8x128xf32>
    %193 = vector.extract_strided_slice %175 {offsets = [0, 256], sizes = [8, 128], strides = [1, 1]} : vector<8x384xf32> to vector<8x128xf32>
    %194 = arith.addf %193, %10 : vector<8x128xf32>
    %195 = arith.mulf %183, %194 : vector<8x128xf32>
    %196 = arith.addf %192, %195 : vector<8x128xf32>
    %197 = math.tanh %196 : vector<8x128xf32>
    %198 = arith.subf %173, %197 : vector<8x128xf32>
    %199 = arith.mulf %191, %198 : vector<8x128xf32>
    %200 = arith.addf %197, %199 : vector<8x128xf32>
    %c56 = arith.constant 56 : index
    %c0_41 = arith.constant 0 : index
    %201 = vector.load %arg8[%c56, %c0_41] : memref<64x384xf32, #tpu.memory_space<vmem>>, vector<8x384xf32>
    %cst_42 = arith.constant dense<0.000000e+00> : vector<8x384xf32>
    %202 = tpu.matmul %200, %7, %cst_42 {dimension_numbers = #tpu.dot_dimension_numbers<[1], [0], [0], [1], [0, 0, 1, 1], [], []>} : vector<8x128xf32>, vector<128x384xf32>, vector<8x384xf32> -> vector<8x384xf32>
    %203 = vector.extract_strided_slice %201 {offsets = [0, 0], sizes = [8, 128], strides = [1, 1]} : vector<8x384xf32> to vector<8x128xf32>
    %204 = vector.extract_strided_slice %202 {offsets = [0, 0], sizes = [8, 128], strides = [1, 1]} : vector<8x384xf32> to vector<8x128xf32>
    %205 = arith.addf %203, %204 : vector<8x128xf32>
    %206 = arith.negf %205 : vector<8x128xf32>
    %207 = math.exp %206 : vector<8x128xf32>
    %cst_43 = arith.constant 1.000000e+00 : f32
    %208 = vector.broadcast %cst_43 : f32 to vector<8x128xf32>
    %209 = arith.addf %208, %207 : vector<8x128xf32>
    %210 = arith.divf %208, %209 : vector<8x128xf32>
    %211 = vector.extract_strided_slice %201 {offsets = [0, 128], sizes = [8, 128], strides = [1, 1]} : vector<8x384xf32> to vector<8x128xf32>
    %212 = vector.extract_strided_slice %202 {offsets = [0, 128], sizes = [8, 128], strides = [1, 1]} : vector<8x384xf32> to vector<8x128xf32>
    %213 = arith.addf %211, %212 : vector<8x128xf32>
    %214 = arith.negf %213 : vector<8x128xf32>
    %215 = math.exp %214 : vector<8x128xf32>
    %cst_44 = arith.constant 1.000000e+00 : f32
    %216 = vector.broadcast %cst_44 : f32 to vector<8x128xf32>
    %217 = arith.addf %216, %215 : vector<8x128xf32>
    %218 = arith.divf %216, %217 : vector<8x128xf32>
    %219 = vector.extract_strided_slice %201 {offsets = [0, 256], sizes = [8, 128], strides = [1, 1]} : vector<8x384xf32> to vector<8x128xf32>
    %220 = vector.extract_strided_slice %202 {offsets = [0, 256], sizes = [8, 128], strides = [1, 1]} : vector<8x384xf32> to vector<8x128xf32>
    %221 = arith.addf %220, %10 : vector<8x128xf32>
    %222 = arith.mulf %210, %221 : vector<8x128xf32>
    %223 = arith.addf %219, %222 : vector<8x128xf32>
    %224 = math.tanh %223 : vector<8x128xf32>
    %225 = arith.subf %200, %224 : vector<8x128xf32>
    %226 = arith.mulf %218, %225 : vector<8x128xf32>
    %227 = arith.addf %224, %226 : vector<8x128xf32>
    %c0_45 = arith.constant 0 : index
    %c0_46 = arith.constant 0 : index
    %228 = vector.load %arg5[%c0_45, %c0_46] : memref<128x128xf32, #tpu.memory_space<vmem>>, vector<128x128xf32>
    %cst_47 = arith.constant dense<0.000000e+00> : vector<8x128xf32>
    %229 = tpu.matmul %227, %228, %cst_47 {dimension_numbers = #tpu.dot_dimension_numbers<[1], [0], [0], [1], [0, 0, 1, 1], [], []>} : vector<8x128xf32>, vector<128x128xf32>, vector<8x128xf32> -> vector<8x128xf32>
    %c0_48 = arith.constant 0 : index
    %c0_49 = arith.constant 0 : index
    %230 = vector.load %arg6[%c0_48, %c0_49] : memref<1x128xf32, #tpu.memory_space<vmem>>, vector<1x128xf32>
    %231 = vector.broadcast %230 : vector<1x128xf32> to vector<8x128xf32>
    %232 = arith.addf %229, %231 : vector<8x128xf32>
    %c0_50 = arith.constant 0 : index
    %c0_51 = arith.constant 0 : index
    %233 = vector.load %arg7[%c0_50, %c0_51] : memref<8x128xf32, #tpu.memory_space<vmem>>, vector<8x128xf32>
    tpu.vector_store %arg7[%c0_50, %c0_51], %232 {strides = array<i32>} : memref<8x128xf32, #tpu.memory_space<vmem>>, vector<8x128xf32>,
    return
  }
}

</mosaic_0001>

<bundles_post_ra>
// kernel: tpu_custom_call.1
= control target key start
LH: loop header
LB: loop body
LE: loop exit
PB: predicated region body
PF: predicated region fallthrough
CT: control target
= control target key end

     0   :  { %12 = vsyncpa [#allocation4], 0  ;;  %s3579_s0 = inlined_call_operand.vmem [shape: f32[64,4], index: 0, kind: input, shape index: {}]   ;;  %s3580_s1 = inlined_call_operand.vmem [shape: f32[4,384], index: 1, kind: input, shape index: {}]   ;;  %s3581_s2 = inlined_call_operand.hbm [shape: f32[128,384], index: 2, kind: input, shape index: {}]   ;;  %s3582_s3 = inlined_call_operand.vmem [shape: f32[1,384], index: 3, kind: input, shape index: {}]   ;;  %s3583_s4 = inlined_call_operand.vmem [shape: f32[1,128], index: 4, kind: input, shape index: {}]   ;;  %s3584_s5 = inlined_call_operand.hbm [shape: f32[128,128], index: 5, kind: input, shape index: {}]   ;;  %s3585_s6 = inlined_call_operand.vmem [shape: f32[1,128], index: 6, kind: input, shape index: {}]   ;;  %s3586_s7 = inlined_call_operand.hbm [shape: f32[8,128], index: 7, kind: output, shape index: {}]  }
   0x1   :  { %13 = vsyncpa [#allocation7], 0 }
   0x2   :  { %14 = vsyncpa [#allocation5], 0  ;;  %s2577_s24 = smov [#allocation3]  }
   0x3   :  { %s24_s25 = sshll.u32 %s2577_s24, 4  ;;  %s25_s25 = int_to_ptr.vmem [resolvable:$true] %s24_s25 }
   0x4   :  { %s2519_s26 = scalar_lea.vmem %s25_s25, 6144  ;;  %p2524_p1 = scmp.lt.s32.totalorder %s25_s25, %s25_s25 }
   0x5   :  { %p2520_p0 = scmp.ne.s32.totalorder %s25_s25, %s2519_s26  ;;  %p2525_p2 = scmp.lt.s32.totalorder %s2519_s26, %s2519_s26 }
   0x7   :  { %p2526_p3 = por %p2525_p2, %p2524_p1 }
   0x9   :  { %p2527_p4 = pnand %p2526_p3, %p2520_p0 }
   0xb   :  { %2530 = shalt.err (!%p2527_p4)
}
   0xc   :  { %s2578_s27 = smov 384   ;;  %s2579_s28 = smov 24  }
   0xd   :  { %30 = dma.hbm_to_vmem [thread:$0]  %s3581_s2, 6144, %s25_s25, [#allocation4], %s2578_s27, %s2578_s27, %s2579_s28  }
   0xe   :  { %s2580_s8 = smov [#allocation6]  }
   0xf   :  { %s40_s9 = sshll.u32 %s2580_s8, 4  ;;  %s41_s9 = int_to_ptr.vmem [resolvable:$true] %s40_s9 }
  0x10   :  { %s2539_s10 = scalar_lea.vmem %s41_s9, 2048  ;;  %p2544_p6 = scmp.lt.s32.totalorder %s41_s9, %s41_s9 }
  0x11   :  { %p2540_p5 = scmp.ne.s32.totalorder %s41_s9, %s2539_s10  ;;  %p2545_p7 = scmp.lt.s32.totalorder %s2539_s10, %s2539_s10 }
  0x13   :  { %p2546_p8 = por %p2545_p7, %p2544_p6 }
  0x15   :  { %p2547_p9 = pnand %p2546_p8, %p2540_p5 }
  0x17   :  { %2550 = shalt.err (!%p2547_p9)
}
  0x18   :  { %s2581_s11 = smov 128   ;;  %s2582_s12 = smov 8  }
  0x19   :  { %46 = dma.hbm_to_vmem [thread:$0]  %s3584_s5, 2048, %s41_s9, [#allocation7], %s2581_s11, %s2581_s11, %s2582_s12  }
  0x1a   :  { %2571 = dma.done.wait [#allocation4], 6144  }
  0x1b   :  { %2572 = vsyncadd [#allocation4], 4294961152 }
  0x1c   :  { %2573 = dma.done.wait [#allocation7], 2048  }
  0x1d   :  { %2574 = vsyncadd [#allocation7], 4294965248  ;;  %v3587_v0 = vmov 0.0   ;;  %v63_v1 = vld [vmem:[%s3580_s1] sm:$0xff]  ;;  %vm110_vm0 = vcmask 1043456   ;;  %vm85_vm1 = vcmask 31744   ;;  %v67_v60 = vlaneseq }
  0x1e   :  { %181 = vmatprep.mubr.f32.mxu0 %v3587_v0  ;;  %v55_v2 = vld [vmem:[%s3579_s0] sm:$0xff]  ;;  %v84_v3 = vcombine.high %v63_v1, %v63_v1  ;;  %v2640_v4 = vld [vmem:[#allocation3 + $0x170] sm:$0xff]  ;;  %v2643_v5 = vld [vmem:[#allocation3 + $0x168] sm:$0xff]  ;;  %vm2584_vm2 = vmmov 0   ;;  %s2585_s14 = smov [#allocation8]  }
  0x1f   :  { %2045 = vmatprep.mubr.msk.f32.mxu1 %vm85_vm1, %v55_v2  ;;  %3606 = vst [vmem:[#allocation12_spill] sm:$0xff] %v2640_v4  ;;  %v2646_v6 = vld [vmem:[#allocation3 + $0x158] sm:$0xff]  ;;  %v2650_v7 = vld [vmem:[#allocation3 + $0x150] sm:$0xff]  ;;  %v56_v8 = vld [vmem:[%s3579_s0 + $0x8] sm:$0xff]  ;;  %v68_v61 = vshrl.u32 %v67_v60, 7  ;;  %s1834_s2 = sshll.u32 %s2585_s14, 4  ;;  %s1835_s2 = int_to_ptr.vmem [resolvable:$true] %s1834_s2 }
  0x20   :  { %1844 = vmatprep.subr.msk.mxu0 %vm110_vm0, %v84_v3  ;;  %v2657_v9 = vld [vmem:[#allocation3 + $0x140] sm:$0xff]  ;;  %v2660_v10 = vld [vmem:[#allocation3 + $0x138] sm:$0xff]  ;;  %v2663_v11 = vld [vmem:[#allocation3 + $0x128] sm:$0xff]  ;;  %s2551_s15 = scalar_lea.vmem %s1835_s2, 128  ;;  %p2556_p11 = scmp.lt.s32.totalorder %s1835_s2, %s1835_s2 }
  0x21   :  { %1845 = vmatpush1.msk.msra.mxu0 %vm110_vm0, %v63_v1  ;;  %v2667_v12 = vld [vmem:[#allocation3 + $0x120] sm:$0xff]  ;;  %v2674_v13 = vld [vmem:[%s3579_s0 + $0x10] sm:$0xff]  ;;  %v2679_v15 = vld [vmem:[#allocation3 + $0x108] sm:$0xff]  ;;  %v69_v62 = vsub.s32 0, %v68_v61  ;;  %p2552_p10 = scmp.ne.s32.totalorder %s1835_s2, %s2551_s15  ;;  %p2557_p12 = scmp.lt.s32.totalorder %s2551_s15, %s2551_s15 }
  0x22   :  { %1846 = vmatmul.mubr.msk.f32.vlgmr.msra.gmra.mxu0 %vm85_vm1, %v55_v2  ;;  %417 = vmatprep.subr.mxu0 %v2640_v4  ;;  %v2676_v14 = vld [vmem:[#allocation3 + $0x110] sm:$0xff]  ;;  %v2682_v16 = vld [vmem:[#allocation3 + $0xf8] sm:$0xff]  ;;  %v64_v17 = vld [vmem:[%s3580_s1 + $0x8] sm:$0xf]  ;;  %v73_v2 = vsub.s32 1, %v68_v61 }
  0x23   :  { %418 = vmatpush1.msra.mxu0 %v2643_v5  ;;  %187 = vmatprep.mubr.f32.mxu0 %v3587_v0  ;;  %v2690_v18 = vld [vmem:[#allocation3 + $0xf0] sm:$0xff]  ;;  %v2697_v19 = vld [vmem:[%s3579_s0 + $0x18] sm:$0xff]  ;;  %v2699_v20 = vld [vmem:[#allocation3 + $0xe0] sm:$0xff]  ;;  %p2558_p13 = por %p2557_p12, %p2556_p11 }
  0x24   :  { %419 = vmatprep.subr.mxu0 %v2646_v6  ;;  %v2702_v21 = vld [vmem:[#allocation3 + $0xd8] sm:$0xff]  ;;  %2043 = vmatprep.subr.msk.mxu1 %vm110_vm0, %v64_v17  ;;  %v2706_v22 = vld [vmem:[#allocation3 + $0xc8] sm:$0xff]  ;;  %v2712_v23 = vld [vmem:[#allocation3 + $0xc0] sm:$0xff] }
  0x25   :  { %420 = vmatpush1.msra.mxu0 %v2650_v7  ;;  %2044 = vmatpush3.msk.msra.mxu1 %vm110_vm0, %v64_v17  ;;  %v2719_v24 = vld [vmem:[%s3579_s0 + $0x20] sm:$0xff]  ;;  %v2721_v25 = vld [vmem:[#allocation3 + $0xb0] sm:$0xff]  ;;  %v2724_v26 = vld [vmem:[#allocation3 + $0xa8] sm:$0xff]  ;;  %p2559_p0 = pnand %p2558_p13, %p2552_p10 }
  0x26   :  { %1847 = vmatmul.mubr.msk.f32.gmra.mxu0 %vm85_vm1, %v56_v8  ;;  %421 = vmatprep.subr.mxu0 %v2657_v9  ;;  %v2728_v27 = vld [vmem:[#allocation3 + $0x98] sm:$0xff]  ;;  %v2736_v29 = vld [vmem:[#allocation3 + $0x90] sm:$0xff]  ;;  %v2743_v30 = vld [vmem:[%s3579_s0 + $0x28] sm:$0xff] }
  0x27   :  { %422 = vmatpush1.msra.mxu0 %v2660_v10  ;;  %193 = vmatprep.mubr.f32.mxu0 %v3587_v0  ;;  %v2731_v28 = vld [vmem:[#allocation3 + $0x178] sm:$0xff]  ;;  %v2745_v31 = vld [vmem:[#allocation3 + $0x80] sm:$0xff]  ;;  %v2752_v33 = vld [vmem:[#allocation3 + $0x68] sm:$0xff] }
  0x28   :  { %423 = vmatprep.subr.mxu0 %v2663_v11  ;;  %2057 = vmatprep.subr.mxu1 %v3587_v0  ;;  %v2748_v32 = vld [vmem:[#allocation3 + $0x78] sm:$0xff]  ;;  %v2755_v34 = vld [vmem:[#allocation3 + $0x160] sm:$0xff]  ;;  %v61_v36 = vld [vmem:[%s3579_s0 + $0x30] sm:$0xff] }
  0x29   :  { %424 = vmatpush1.msra.mxu0 %v2667_v12  ;;  %2046 = vmatmul.mubr.msk.f32.vlgmr.msra.gmra.mxu1 %vm85_vm1, %v56_v8  ;;  %v2760_v35 = vld [vmem:[#allocation3 + $0x60] sm:$0xff]  ;;  %v2767_v37 = vld [vmem:[#allocation3 + $0x50] sm:$0xff]  ;;  %v2770_v38 = vld [vmem:[#allocation3 + $0x48] sm:$0xff] }
  0x2a   :  { %1848 = vmatmul.mubr.msk.f32.gmra.mxu0 %vm85_vm1, %v2674_v13  ;;  %425 = vmatprep.subr.mxu0 %v2676_v14  ;;  %v2774_v39 = vld [vmem:[#allocation3 + $0x38] sm:$0xff]  ;;  %v2777_v40 = vld [vmem:[#allocation3 + $0x148] sm:$0xff]  ;;  %v2781_v41 = vld [vmem:[#allocation3 + $0x30] sm:$0xff] }
  0x2b   :  { %426 = vmatpush1.msra.mxu0 %v2679_v15  ;;  %199 = vmatprep.mubr.f32.mxu0 %v3587_v0  ;;  %v62_v42 = vld [vmem:[%s3579_s0 + $0x38] sm:$0xff]  ;;  %v2788_v43 = vld [vmem:[#allocation3 + $0x20] sm:$0xff]  ;;  %v2795_v45 = vld [vmem:[#allocation3 + $0x8] sm:$0xff] }
  0x2c   :  { %427 = vmatprep.subr.mxu0 %v2682_v16  ;;  %2058 = vmatpush3.msra.mxu1 %v2731_v28  ;;  %v2791_v44 = vld [vmem:[#allocation3 + $0x18] sm:$0xff]  ;;  %3608 = vst [vmem:[#allocation14_spill] sm:$0xff] %v2795_v45  ;;  %v2798_v46 = vld [vmem:[#allocation3 + $0x130] sm:$0xff]  ;;  %v2802_v47 = vld [vmem:[#allocation3] sm:$0xff] }
  0x2d   :  { %428 = vmatpush1.msra.mxu0 %v2690_v18  ;;  %2059 = vmatprep.subr.mxu1 %v3587_v0  ;;  %3607 = vst [vmem:[#allocation13_spill] sm:$0xff] %v2791_v44  ;;  %3609 = vst [vmem:[#allocation15_spill] sm:$0xff] %v2802_v47  ;;  %v2806_v48 = vld [vmem:[#allocation3 + $0x118] sm:$0xff]  ;;  %v2812_v49 = vld [vmem:[#allocation3 + $0x100] sm:$0xff] }
  0x2e   :  { %1849 = vmatmul.mubr.msk.f32.gmra.mxu0 %vm85_vm1, %v2697_v19  ;;  %429 = vmatprep.subr.mxu0 %v2699_v20  ;;  %v2817_v50 = vld [vmem:[#allocation3 + $0xe8] sm:$0xff]  ;;  %v2824_v51 = vld [vmem:[#allocation3 + $0xd0] sm:$0xff]  ;;  %v2832_v52 = vld [vmem:[#allocation3 + $0xb8] sm:$0xff] }
  0x2f   :  { %430 = vmatpush1.msra.mxu0 %v2702_v21  ;;  %205 = vmatprep.mubr.f32.mxu0 %v3587_v0  ;;  %v2838_v53 = vld [vmem:[#allocation3 + $0xa0] sm:$0xff]  ;;  %v2845_v54 = vld [vmem:[#allocation3 + $0x88] sm:$0xff]  ;;  %v2851_v55 = vld [vmem:[#allocation3 + $0x70] sm:$0xff] }
  0x30   :  { %431 = vmatprep.subr.mxu0 %v2706_v22  ;;  %2060 = vmatpush3.msra.mxu1 %v2755_v34  ;;  %v2858_v56 = vld [vmem:[#allocation3 + $0x58] sm:$0xff]  ;;  %v2864_v57 = vld [vmem:[#allocation3 + $0x40] sm:$0xff]  ;;  %v2870_v58 = vld [vmem:[#allocation3 + $0x28] sm:$0xff] }
  0x31   :  { %432 = vmatpush1.msra.mxu0 %v2712_v23  ;;  %2061 = vmatprep.subr.mxu1 %v3587_v0  ;;  %3610 = vst [vmem:[#allocation16_spill] sm:$0xff] %v2870_v58  ;;  %v2876_v59 = vld [vmem:[#allocation3 + $0x10] sm:$0xff]  ;;  %v65_v63 = vld [vmem:[%s3582_s3] sm:$0x7] }
  0x32   :  { %1850 = vmatmul.mubr.msk.f32.gmra.mxu0 %vm85_vm1, %v2719_v24  ;;  %433 = vmatprep.subr.mxu0 %v2721_v25  ;;  %3611 = vst [vmem:[#allocation17_spill] sm:$0xff] %v2876_v59  ;;  %v70_v8 = vrot.slane %v65_v63, %v69_v62  ;;  %v74_v17 = vrot.slane %v65_v63, %v73_v2 }
  0x33   :  { %434 = vmatpush1.msra.mxu0 %v2724_v26  ;;  %211 = vmatprep.mubr.f32.mxu0 %v3587_v0 }
  0x34   :  { %435 = vmatprep.subr.mxu0 %v2728_v27  ;;  %2062 = vmatpush3.msra.mxu1 %v2777_v40 }
  0x35   :  { %436 = vmatpush1.msra.mxu0 %v2736_v29  ;;  %2063 = vmatprep.subr.mxu1 %v3587_v0 }
  0x36   :  { %1851 = vmatmul.mubr.msk.f32.gmra.mxu0 %vm85_vm1, %v2743_v30  ;;  %437 = vmatprep.subr.mxu0 %v2745_v31 }
  0x37   :  { %438 = vmatpush1.msra.mxu0 %v2748_v32  ;;  %217 = vmatprep.mubr.f32.mxu0 %v3587_v0 }
  0x38   :  { %439 = vmatprep.subr.mxu0 %v2752_v33  ;;  %2064 = vmatpush3.msra.mxu1 %v2798_v46 }
  0x39   :  { %440 = vmatpush1.msra.mxu0 %v2760_v35  ;;  %2065 = vmatprep.subr.mxu1 %v3587_v0 }
  0x3a   :  { %1852 = vmatmul.mubr.msk.f32.gmra.mxu0 %vm85_vm1, %v61_v36  ;;  %441 = vmatprep.subr.mxu0 %v2767_v37 }
  0x3b   :  { %442 = vmatpush1.msra.mxu0 %v2770_v38  ;;  %223 = vmatprep.mubr.f32.mxu0 %v3587_v0 }
  0x3c   :  { %443 = vmatprep.subr.mxu0 %v2774_v39  ;;  %2066 = vmatpush3.msra.mxu1 %v2806_v48 }
  0x3d   :  { %444 = vmatpush1.msra.mxu0 %v2781_v41  ;;  %2067 = vmatprep.subr.mxu1 %v3587_v0 }
  0x3e   :  { %1853 = vmatmul.mubr.msk.f32.gmra.mxu0 %vm85_vm1, %v62_v42  ;;  %445 = vmatprep.subr.mxu0 %v2788_v43 }
  0x3f   :  { %446 = vmatpush1.msra.mxu0 %v2791_v44  ;;  %481 = vmatprep.mubr.f32.mxu0 %v3587_v0 }
  0x40   :  { %447 = vmatprep.subr.mxu0 %v2795_v45  ;;  %2048 = vmatprep.mubr.msk.f32.mxu1 %vm85_vm1, %v2674_v13 }
  0x41   :  { %448 = vmatpush1.msra.mxu0 %v2802_v47  ;;  %2068 = vmatpush3.msra.mxu1 %v2812_v49 }
  0x42   :  { %482 = vmatmul.mubr.f32.vlgmr.msra.gmra.mxu0 %v3587_v0  ;;  %582 = vmatprep.subr.mxu0 %v2640_v4 }
  0x43   :  { %2069 = vmatprep.subr.mxu1 %v3587_v0  ;;  %2049 = vmatmul.mubr.msk.f32.gmra.mxu1 %vm85_vm1, %v2697_v19 }
  0x44   :  { %2070 = vmatpush3.msra.mxu1 %v2817_v50  ;;  %2051 = vmatprep.mubr.msk.f32.mxu1 %vm85_vm1, %v2719_v24 }
  0x45   :  { %2071 = vmatprep.subr.mxu1 %v3587_v0  ;;  %583 = vmatpush1.msra.mxu0 %v2643_v5 }
  0x46   :  { %2072 = vmatpush3.msra.mxu1 %v2824_v51  ;;  %584 = vmatprep.subr.mxu0 %v2646_v6 }
  0x47   :  { %2073 = vmatprep.subr.mxu1 %v3587_v0  ;;  %2052 = vmatmul.mubr.msk.f32.gmra.mxu1 %vm85_vm1, %v2743_v30 }
  0x48   :  { %2074 = vmatpush3.msra.mxu1 %v2832_v52  ;;  %2054 = vmatprep.mubr.msk.f32.mxu1 %vm85_vm1, %v61_v36 }
  0x49   :  { %2075 = vmatprep.subr.mxu1 %v3587_v0  ;;  %585 = vmatpush1.msra.mxu0 %v2650_v7 }
  0x4a   :  { %2076 = vmatpush3.msra.mxu1 %v2838_v53  ;;  %586 = vmatprep.subr.mxu0 %v2657_v9 }
  0x4b   :  { %2077 = vmatprep.subr.mxu1 %v3587_v0  ;;  %2055 = vmatmul.mubr.msk.f32.gmra.mxu1 %vm85_vm1, %v62_v42  ;;  %v77_v42 = vsub.s32 2, %v68_v61 }
  0x4c   :  { %2078 = vmatpush3.msra.mxu1 %v2845_v54  ;;  %2089 = vmatprep.mubr.msk.f32.mxu1 %vm2584_vm2, %v3587_v0 }
  0x4d   :  { %2079 = vmatprep.subr.mxu1 %v3587_v0  ;;  %587 = vmatpush1.msra.mxu0 %v2660_v10 }
  0x4e   :  { %2080 = vmatpush3.msra.mxu1 %v2851_v55  ;;  %588 = vmatprep.subr.mxu0 %v2663_v11 }
  0x4f   :  { %2081 = vmatprep.subr.mxu1 %v3587_v0  ;;  %589 = vmatpush1.msra.mxu0 %v2667_v12 }
  0x50   :  { %2082 = vmatpush3.msra.mxu1 %v2858_v56  ;;  %590 = vmatprep.subr.mxu0 %v2676_v14 }
  0x51   :  { %2083 = vmatprep.subr.mxu1 %v3587_v0  ;;  %591 = vmatpush1.msra.mxu0 %v2679_v15 }
  0x52   :  { %2084 = vmatpush3.msra.mxu1 %v2864_v57  ;;  %592 = vmatprep.subr.mxu0 %v2682_v16 }
  0x53   :  { %2085 = vmatprep.subr.mxu1 %v3587_v0  ;;  %593 = vmatpush1.msra.mxu0 %v2690_v18 }
  0x54   :  { %2086 = vmatpush3.msra.mxu1 %v2870_v58  ;;  %594 = vmatprep.subr.mxu0 %v2699_v20 }
  0x55   :  { %2087 = vmatprep.subr.mxu1 %v3587_v0  ;;  %595 = vmatpush1.msra.mxu0 %v2702_v21 }
  0x56   :  { %2088 = vmatpush3.msra.mxu1 %v2876_v59  ;;  %596 = vmatprep.subr.mxu0 %v2706_v22 }
  0x57   :  { %2090 = vmatmul.mubr.f32.vlgmr.msra.gmra.mxu1 %v3587_v0  ;;  %2092 = vmatprep.subr.mxu1 %v3587_v0 }
  0x58   :  { %2093 = vmatpush3.msra.mxu1 %v2731_v28  ;;  %597 = vmatpush1.msra.mxu0 %v2712_v23 }
  0x59   :  { %2094 = vmatprep.subr.mxu1 %v3587_v0  ;;  %598 = vmatprep.subr.mxu0 %v2721_v25 }
  0x5a   :  { %2095 = vmatpush3.msra.mxu1 %v2755_v34  ;;  %599 = vmatpush1.msra.mxu0 %v2724_v26 }
  0x5b   :  { %2096 = vmatprep.subr.mxu1 %v3587_v0  ;;  %600 = vmatprep.subr.mxu0 %v2728_v27 }
  0x5c   :  { %2097 = vmatpush3.msra.mxu1 %v2777_v40  ;;  %601 = vmatpush1.msra.mxu0 %v2736_v29 }
  0x5d   :  { %2098 = vmatprep.subr.mxu1 %v3587_v0  ;;  %602 = vmatprep.subr.mxu0 %v2745_v31 }
  0x5e   :  { %2099 = vmatpush3.msra.mxu1 %v2798_v46  ;;  %603 = vmatpush1.msra.mxu0 %v2748_v32 }
  0x5f   :  { %2100 = vmatprep.subr.mxu1 %v3587_v0  ;;  %604 = vmatprep.subr.mxu0 %v2752_v33 }
  0x60   :  { %2101 = vmatpush3.msra.mxu1 %v2806_v48  ;;  %605 = vmatpush1.msra.mxu0 %v2760_v35 }
  0x61   :  { %2102 = vmatprep.subr.mxu1 %v3587_v0  ;;  %606 = vmatprep.subr.mxu0 %v2767_v37 }
  0x62   :  { %2103 = vmatpush3.msra.mxu1 %v2812_v49  ;;  %607 = vmatpush1.msra.mxu0 %v2770_v38 }
  0x63   :  { %2104 = vmatprep.subr.mxu1 %v3587_v0  ;;  %608 = vmatprep.subr.mxu0 %v2774_v39 }
  0x64   :  { %2105 = vmatpush3.msra.mxu1 %v2817_v50  ;;  %609 = vmatpush1.msra.mxu0 %v2781_v41 }
  0x65   :  { %2106 = vmatprep.subr.mxu1 %v3587_v0  ;;  %610 = vmatprep.subr.mxu0 %v2788_v43 }
  0x66   :  { %2107 = vmatpush3.msra.mxu1 %v2824_v51  ;;  %611 = vmatpush1.msra.mxu0 %v2791_v44 }
  0x67   :  { %2108 = vmatprep.subr.mxu1 %v3587_v0  ;;  %612 = vmatprep.subr.mxu0 %v2795_v45 }
  0x68   :  { %2109 = vmatpush3.msra.mxu1 %v2832_v52  ;;  %613 = vmatpush1.msra.mxu0 %v2802_v47  ;;  %v78_v47 = vrot.slane %v65_v63, %v77_v42 }
  0x69   :  { %2110 = vmatprep.subr.mxu1 %v3587_v0  ;;  %646 = vmatprep.mubr.f32.mxu0 %v3587_v0 }
  0x6a   :  { %2111 = vmatpush3.msra.mxu1 %v2838_v53  ;;  %2124 = vmatprep.mubr.msk.f32.mxu1 %vm2584_vm2, %v3587_v0 }
  0x6b   :  { %2112 = vmatprep.subr.mxu1 %v3587_v0  ;;  %747 = vmatprep.subr.mxu0 %v2640_v4 }
  0x6c   :  { %2113 = vmatpush3.msra.mxu1 %v2845_v54 }
  0x6d   :  { %2114 = vmatprep.subr.mxu1 %v3587_v0 }
  0x6e   :  { %2115 = vmatpush3.msra.mxu1 %v2851_v55 }
  0x6f   :  { %2116 = vmatprep.subr.mxu1 %v3587_v0 }
  0x70   :  { %2117 = vmatpush3.msra.mxu1 %v2858_v56 }
  0x71   :  { %2118 = vmatprep.subr.mxu1 %v3587_v0 }
  0x72   :  { %2119 = vmatpush3.msra.mxu1 %v2864_v57 }
  0x73   :  { %2120 = vmatprep.subr.mxu1 %v3587_v0 }
  0x74   :  { %2121 = vmatpush3.msra.mxu1 %v2870_v58 }
  0x75   :  { %2122 = vmatprep.subr.mxu1 %v3587_v0 }
  0x76   :  { %2123 = vmatpush3.msra.mxu1 %v2876_v59 }
  0x77   :  { %2127 = vmatprep.subr.mxu1 %v3587_v0 }
  0xe2   :  { %v183_v1 = vpop.f32.mrf.mxu0 }
  0xe4   :  { %v185_v3 = vpop.f32.mrf.mxu0 }
  0xe6   :  { %v189_v13 = vpop.f32.mrf.mxu0 }
  0xe7   :  { %v2943_v19 = vadd.f32 %v189_v13, %v70_v8 }
  0xe8   :  { %v191_v24 = vpop.f32.mrf.mxu0 }
  0xe9   :  { %3612 = vst [vmem:[#allocation18_spill] sm:$0xff] %v2943_v19  ;;  %v2945_v30 = vadd.f32 %v191_v24, %v74_v17  ;;  %v2047_v2 = vpop.f32.mrf.mxu1 }
  0xea   :  { %v195_v36 = vpop.f32.mrf.mxu0  ;;  %v2955_v19 = vadd.f32 %v2047_v2, %v78_v47 }
  0xeb   :  { %3613 = vst [vmem:[#allocation19_spill] sm:$0xff] %v2945_v30  ;;  %v2947_v0 = vadd.f32 %v195_v36, %v70_v8 }
  0xec   :  { %v197_v60 = vpop.f32.mrf.mxu0  ;;  %3618 = vst [vmem:[#allocation24_spill] sm:$0xff] %v2955_v19 }
  0xed   :  { %3614 = vst [vmem:[#allocation20_spill] sm:$0xff] %v2947_v0  ;;  %v2949_v4 = vadd.f32 %v197_v60, %v74_v17 }
  0xee   :  { %v201_v59 = vpop.f32.mrf.mxu0 }
  0xef   :  { %3615 = vst [vmem:[#allocation21_spill] sm:$0xff] %v2949_v4  ;;  %v2951_v45 = vadd.f32 %v201_v59, %v70_v8 }
  0xf0   :  { %v203_v58 = vpop.f32.mrf.mxu0 }
  0xf1   :  { %3616 = vst [vmem:[#allocation22_spill] sm:$0xff] %v2951_v45  ;;  %v2953_v62 = vadd.f32 %v203_v58, %v74_v17 }
  0xf2   :  { %v207_v13 = vpop.f32.mrf.mxu0 }
  0xf3   :  { %3617 = vst [vmem:[#allocation23_spill] sm:$0xff] %v2953_v62  ;;  %v2957_v24 = vadd.f32 %v207_v13, %v70_v8 }
  0xf4   :  { %v209_v30 = vpop.f32.mrf.mxu0 }
  0xf5   :  { %3619 = vst [vmem:[#allocation25_spill] sm:$0xff] %v2957_v24  ;;  %v2959_v61 = vadd.f32 %v209_v30, %v74_v17  ;;  %v184_v24 = vadd.f32 %v183_v1, %v70_v8 }
  0xf6   :  { %v213_v36 = vpop.f32.mrf.mxu0 }
  0xf7   :  { %3620 = vst [vmem:[#allocation26_spill] sm:$0xff] %v2959_v61  ;;  %v2961_v0 = vadd.f32 %v213_v36, %v70_v8  ;;  %v296_v36 = vpop.f32.mrf.mxu1 }
  0xf8   :  { %v215_v60 = vpop.f32.mrf.mxu0 }
  0xf9   :  { %3621 = vst [vmem:[#allocation27_spill] sm:$0xff] %v2961_v0  ;;  %v2963_v4 = vadd.f32 %v215_v60, %v74_v17 }
  0xfa   :  { %v219_v59 = vpop.f32.mrf.mxu0 }
  0xfb   :  { %3622 = vst [vmem:[#allocation28_spill] sm:$0xff] %v2963_v4  ;;  %v2965_v63 = vadd.f32 %v219_v59, %v70_v8  ;;  %v186_v4 = vadd.f32 %v185_v3, %v74_v17  ;;  %v2988_v3 = vld [vmem:[%s3583_s4] ss:$0 sm:$0xff] }
  0xfc   :  { %v221_v58 = vpop.f32.mrf.mxu0 }
  0xfd   :  { %3623 = vst [vmem:[#allocation29_spill] sm:$0xff] %v2965_v63  ;;  %v2967_v42 = vadd.f32 %v221_v58, %v74_v17 }
  0xfe   :  { %v225_v62 = vpop.f32.mrf.mxu0 }
  0xff   :  { %3624 = vst [vmem:[#allocation30_spill] sm:$0xff] %v2967_v42  ;;  %v2969_v2 = vadd.f32 %v225_v62, %v70_v8 }
 0x100   :  { %v227_v13 = vpop.f32.mrf.mxu0 }
 0x101   :  { %3625 = vst [vmem:[#allocation31_spill] sm:$0xff] %v2969_v2  ;;  %v2971_v45 = vadd.f32 %v227_v13, %v74_v17 }
 0x102   :  { %v483_v30 = vpop.f32.mrf.mxu0 }
 0x103   :  { %3626 = vst [vmem:[#allocation32_spill] sm:$0xff] %v2971_v45  ;;  %v558_v61 = vadd.f32 %v483_v30, %v184_v24  ;;  %v2050_v19 = vpop.f32.mrf.mxu1 }
 0x104   :  { %v2973_v60 = vadd.f32 %v2050_v19, %v78_v47  ;;  %v485_v62 = vpop.f32.mrf.mxu0 }
 0x105   :  { %v1864_v0 = vmul.f32 -1.442695, %v558_v61  ;;  %v306_v59 = vpop.f32.mrf.mxu1  ;;  %v565_v13 = vadd.f32 %v485_v62, %v186_v4  ;;  %v297_v62 = vadd.f32 %v296_v36, %v78_v47  ;;  %v3634_v36 = vld [vmem:[#allocation16_spill] sm:$0xff] }
 0x106   :  { %3627 = vst [vmem:[#allocation33_spill] sm:$0xff] %v2973_v60  ;;  %v2975_v63 = vadd.f32 %v306_v59, %v78_v47 }
 0x107   :  { %2382 = vpow2.f32 %v1864_v0  ;;  %v2053_v58 = vpop.f32.mrf.mxu1  ;;  %v1865_v19 = vmul.f32 -1.442695, %v565_v13 }
 0x108   :  { %3628 = vst [vmem:[#allocation34_spill] sm:$0xff] %v2975_v63  ;;  %v2977_v42 = vadd.f32 %v2053_v58, %v78_v47 }
 0x109   :  { %v316_v2 = vpop.f32.mrf.mxu1  ;;  %2384 = vpow2.f32 %v1865_v19 }
 0x10a   :  { %3629 = vst [vmem:[#allocation35_spill] sm:$0xff] %v2977_v42  ;;  %v2979_v1 = vadd.f32 %v316_v2, %v78_v47 }
 0x10b   :  { %v2056_v8 = vpop.f32.mrf.mxu1 }
 0x10c   :  { %3630 = vst [vmem:[#allocation36_spill] sm:$0xff] %v2979_v1  ;;  %v2981_v24 = vadd.f32 %v2056_v8, %v78_v47 }
 0x10d   :  { %v326_v61 = vpop.f32.mrf.mxu1 }
 0x10e   :  { %3631 = vst [vmem:[#allocation37_spill] sm:$0xff] %v2981_v24  ;;  %v2983_v30 = vadd.f32 %v326_v61, %v78_v47  ;;  %v3633_v47 = vmov 0.0  }
 0x110   :  { %3632 = vst [vmem:[#allocation38_spill] sm:$0xff] %v2983_v30 }
 0x114   :  { %v2383_v0 = vpop.eup %2382 }
 0x115   :  { %v562_v45 = vadd.f32 1.0, %v2383_v0 }
 0x116   :  { %v2385_v4 = vpop.eup %2384 }
 0x117   :  { %2386 = vrcp.f32 %v562_v45  ;;  %v554_v59 = vpop.f32.mrf.mxu1  ;;  %v569_v61 = vadd.f32 1.0, %v2385_v4  ;;  %v3638_v4 = vld [vmem:[#allocation12_spill] sm:$0xff] }
 0x118   :  { %v572_v17 = vadd.f32 %v2988_v3, %v554_v59  ;;  %v3636_v59 = vld [vmem:[#allocation15_spill] sm:$0xff] }
 0x119   :  { %v2091_v58 = vpop.f32.mrf.mxu1 }
 0x124   :  { %v2387_v2 = vpop.eup %2386 }
 0x125   :  { %v573_v8 = vmul.f32 %v2387_v2, %v572_v17  ;;  %v3637_v17 = vld [vmem:[#allocation17_spill] sm:$0xff] }
 0x127   :  { %v574_v24 = vadd.f32 %v573_v8, %v297_v62  ;;  %v3639_v8 = vld [vmem:[#allocation18_spill] sm:$0xff] }
 0x129   :  { %2388 = vtanh.f32 %v574_v24  ;;  %v3635_v24 = vld [vmem:[#allocation14_spill] sm:$0xff] }
 0x12a   :  { %2390 = vrcp.f32 %v569_v61 }
 0x136   :  { %v2389_v13 = vpop.eup %2388 }
 0x137   :  { %v576_v19 = vsub.f32 0.0, %v2389_v13  ;;  %v2391_v45 = vpop.eup %2390 }
 0x139   :  { %v577_v0 = vmul.f32 %v2391_v45, %v576_v19 }
 0x13b   :  { %v2991_v58 = vadd.f32 %v2389_v13, %v577_v0  ;;  %v3640_v0 = vld [vmem:[#allocation19_spill] sm:$0xff] }
 0x13d   :  { %647 = vmatmul.mubr.f32.vlgmr.msra.gmra.mxu0 %v2991_v58  ;;  %2125 = vmatmul.mubr.f32.vlgmr.msra.gmra.mxu1 %v2991_v58 }
 0x13e   :  { %748 = vmatpush1.msra.mxu0 %v2643_v5  ;;  %2128 = vmatpush3.msra.mxu1 %v2731_v28 }
 0x13f   :  { %749 = vmatprep.subr.mxu0 %v2646_v6  ;;  %2129 = vmatprep.subr.mxu1 %v3633_v47 }
 0x140   :  { %750 = vmatpush1.msra.mxu0 %v2650_v7  ;;  %2130 = vmatpush3.msra.mxu1 %v2755_v34 }
 0x141   :  { %751 = vmatprep.subr.mxu0 %v2657_v9  ;;  %2131 = vmatprep.subr.mxu1 %v3633_v47 }
 0x142   :  { %752 = vmatpush1.msra.mxu0 %v2660_v10  ;;  %2132 = vmatpush3.msra.mxu1 %v2777_v40 }
 0x143   :  { %753 = vmatprep.subr.mxu0 %v2663_v11  ;;  %2133 = vmatprep.subr.mxu1 %v3633_v47 }
 0x144   :  { %754 = vmatpush1.msra.mxu0 %v2667_v12  ;;  %2134 = vmatpush3.msra.mxu1 %v2798_v46 }
 0x145   :  { %755 = vmatprep.subr.mxu0 %v2676_v14  ;;  %2135 = vmatprep.subr.mxu1 %v3633_v47 }
 0x146   :  { %756 = vmatpush1.msra.mxu0 %v2679_v15  ;;  %2136 = vmatpush3.msra.mxu1 %v2806_v48 }
 0x147   :  { %757 = vmatprep.subr.mxu0 %v2682_v16  ;;  %2137 = vmatprep.subr.mxu1 %v3633_v47 }
 0x148   :  { %758 = vmatpush1.msra.mxu0 %v2690_v18  ;;  %2138 = vmatpush3.msra.mxu1 %v2812_v49 }
 0x149   :  { %759 = vmatprep.subr.mxu0 %v2699_v20  ;;  %2139 = vmatprep.subr.mxu1 %v3633_v47 }
 0x14a   :  { %760 = vmatpush1.msra.mxu0 %v2702_v21  ;;  %2140 = vmatpush3.msra.mxu1 %v2817_v50 }
 0x14b   :  { %761 = vmatprep.subr.mxu0 %v2706_v22  ;;  %2141 = vmatprep.subr.mxu1 %v3633_v47 }
 0x14c   :  { %762 = vmatpush1.msra.mxu0 %v2712_v23  ;;  %2142 = vmatpush3.msra.mxu1 %v2824_v51 }
 0x14d   :  { %763 = vmatprep.subr.mxu0 %v2721_v25  ;;  %2143 = vmatprep.subr.mxu1 %v3633_v47 }
 0x14e   :  { %764 = vmatpush1.msra.mxu0 %v2724_v26  ;;  %2144 = vmatpush3.msra.mxu1 %v2832_v52 }
 0x14f   :  { %765 = vmatprep.subr.mxu0 %v2728_v27  ;;  %2145 = vmatprep.subr.mxu1 %v3633_v47 }
 0x150   :  { %766 = vmatpush1.msra.mxu0 %v2736_v29  ;;  %2146 = vmatpush3.msra.mxu1 %v2838_v53 }
 0x151   :  { %767 = vmatprep.subr.mxu0 %v2745_v31  ;;  %2147 = vmatprep.subr.mxu1 %v3633_v47 }
 0x152   :  { %768 = vmatpush1.msra.mxu0 %v2748_v32  ;;  %2148 = vmatpush3.msra.mxu1 %v2845_v54 }
 0x153   :  { %769 = vmatprep.subr.mxu0 %v2752_v33  ;;  %2149 = vmatprep.subr.mxu1 %v3633_v47 }
 0x154   :  { %770 = vmatpush1.msra.mxu0 %v2760_v35  ;;  %2150 = vmatpush3.msra.mxu1 %v2851_v55 }
 0x155   :  { %771 = vmatprep.subr.mxu0 %v2767_v37  ;;  %2151 = vmatprep.subr.mxu1 %v3633_v47 }
 0x156   :  { %772 = vmatpush1.msra.mxu0 %v2770_v38  ;;  %2152 = vmatpush3.msra.mxu1 %v2858_v56 }
 0x157   :  { %773 = vmatprep.subr.mxu0 %v2774_v39  ;;  %2153 = vmatprep.subr.mxu1 %v3633_v47 }
 0x158   :  { %774 = vmatpush1.msra.mxu0 %v2781_v41  ;;  %2154 = vmatpush3.msra.mxu1 %v2864_v57 }
 0x159   :  { %775 = vmatprep.subr.mxu0 %v2788_v43  ;;  %2155 = vmatprep.subr.mxu1 %v3633_v47 }
 0x15a   :  { %776 = vmatpush1.msra.mxu0 %v2791_v44  ;;  %2156 = vmatpush3.msra.mxu1 %v3634_v36 }
 0x15b   :  { %777 = vmatprep.subr.mxu0 %v3635_v24  ;;  %2157 = vmatprep.subr.mxu1 %v3633_v47  ;;  %v3641_v24 = vld [vmem:[#allocation24_spill] sm:$0xff] }
 0x15c   :  { %778 = vmatpush1.msra.mxu0 %v3636_v59  ;;  %811 = vmatprep.mubr.f32.mxu0 %v3633_v47 }
 0x15d   :  { %2158 = vmatpush3.msra.mxu1 %v3637_v17  ;;  %2159 = vmatprep.mubr.msk.f32.mxu1 %vm2584_vm2, %v3633_v47 }
 0x15e   :  { %912 = vmatprep.subr.mxu0 %v3638_v4  ;;  %2162 = vmatprep.subr.mxu1 %v3633_v47 }
 0x1fd   :  { %v648_v2 = vpop.f32.mrf.mxu0  ;;  %v719_v62 = vpop.f32.mrf.mxu1 }
 0x1fe   :  { %v723_v61 = vadd.f32 %v648_v2, %v3639_v8  ;;  %v737_v4 = vadd.f32 %v2988_v3, %v719_v62 }
 0x1ff   :  { %v2126_v13 = vpop.f32.mrf.mxu1  ;;  %v650_v45 = vpop.f32.mrf.mxu0 }
 0x200   :  { %v1866_v19 = vmul.f32 -1.442695, %v723_v61  ;;  %v730_v30 = vadd.f32 %v650_v45, %v3640_v0  ;;  %v3649_v45 = vld [vmem:[#allocation21_spill] sm:$0xff] }
 0x202   :  { %2392 = vpow2.f32 %v1866_v19  ;;  %v1867_v42 = vmul.f32 -1.442695, %v730_v30 }
 0x204   :  { %2394 = vpow2.f32 %v1867_v42  ;;  %v3644_v42 = vld [vmem:[#allocation14_spill] sm:$0xff] }
 0x20f   :  { %v2393_v1 = vpop.eup %2392 }
 0x210   :  { %v727_v60 = vadd.f32 1.0, %v2393_v1  ;;  %v3646_v1 = vld [vmem:[#allocation17_spill] sm:$0xff] }
 0x211   :  { %v2395_v63 = vpop.eup %2394 }
 0x212   :  { %2396 = vrcp.f32 %v727_v60  ;;  %v734_v44 = vadd.f32 1.0, %v2395_v63  ;;  %v3643_v63 = vld [vmem:[#allocation16_spill] sm:$0xff]  ;;  %v3645_v60 = vld [vmem:[#allocation15_spill] sm:$0xff] }
 0x21f   :  { %v2397_v17 = vpop.eup %2396 }
 0x220   :  { %v738_v59 = vmul.f32 %v2397_v17, %v737_v4 }
 0x222   :  { %v739_v36 = vadd.f32 %v738_v59, %v3641_v24  ;;  %v3648_v59 = vld [vmem:[#allocation20_spill] sm:$0xff] }
 0x224   :  { %2398 = vtanh.f32 %v739_v36 }
 0x225   :  { %2400 = vrcp.f32 %v734_v44  ;;  %v3642_v44 = vld [vmem:[#allocation13_spill] sm:$0xff] }
 0x231   :  { %v2399_v2 = vpop.eup %2398 }
 0x232   :  { %v741_v8 = vsub.f32 %v2991_v58, %v2399_v2  ;;  %v2401_v61 = vpop.eup %2400  ;;  %v3647_v58 = vld [vmem:[#allocation12_spill] sm:$0xff] }
 0x234   :  { %v742_v13 = vmul.f32 %v2401_v61, %v741_v8 }
 0x236   :  { %v3067_v30 = vadd.f32 %v2399_v2, %v742_v13 }
 0x238   :  { %812 = vmatmul.mubr.f32.vlgmr.msra.gmra.mxu0 %v3067_v30  ;;  %2160 = vmatmul.mubr.f32.vlgmr.msra.gmra.mxu1 %v3067_v30 }
 0x239   :  { %913 = vmatpush1.msra.mxu0 %v2643_v5  ;;  %2163 = vmatpush3.msra.mxu1 %v2731_v28 }
 0x23a   :  { %914 = vmatprep.subr.mxu0 %v2646_v6  ;;  %2164 = vmatprep.subr.mxu1 %v3633_v47 }
 0x23b   :  { %915 = vmatpush1.msra.mxu0 %v2650_v7  ;;  %2165 = vmatpush3.msra.mxu1 %v2755_v34 }
 0x23c   :  { %916 = vmatprep.subr.mxu0 %v2657_v9  ;;  %2166 = vmatprep.subr.mxu1 %v3633_v47 }
 0x23d   :  { %917 = vmatpush1.msra.mxu0 %v2660_v10  ;;  %2167 = vmatpush3.msra.mxu1 %v2777_v40 }
 0x23e   :  { %918 = vmatprep.subr.mxu0 %v2663_v11  ;;  %2168 = vmatprep.subr.mxu1 %v3633_v47 }
 0x23f   :  { %919 = vmatpush1.msra.mxu0 %v2667_v12  ;;  %2169 = vmatpush3.msra.mxu1 %v2798_v46 }
 0x240   :  { %920 = vmatprep.subr.mxu0 %v2676_v14  ;;  %2170 = vmatprep.subr.mxu1 %v3633_v47 }
 0x241   :  { %921 = vmatpush1.msra.mxu0 %v2679_v15  ;;  %2171 = vmatpush3.msra.mxu1 %v2806_v48 }
 0x242   :  { %922 = vmatprep.subr.mxu0 %v2682_v16  ;;  %2172 = vmatprep.subr.mxu1 %v3633_v47 }
 0x243   :  { %923 = vmatpush1.msra.mxu0 %v2690_v18  ;;  %2173 = vmatpush3.msra.mxu1 %v2812_v49 }
 0x244   :  { %924 = vmatprep.subr.mxu0 %v2699_v20  ;;  %2174 = vmatprep.subr.mxu1 %v3633_v47 }
 0x245   :  { %925 = vmatpush1.msra.mxu0 %v2702_v21  ;;  %2175 = vmatpush3.msra.mxu1 %v2817_v50 }
 0x246   :  { %926 = vmatprep.subr.mxu0 %v2706_v22  ;;  %2176 = vmatprep.subr.mxu1 %v3633_v47 }
 0x247   :  { %927 = vmatpush1.msra.mxu0 %v2712_v23  ;;  %2177 = vmatpush3.msra.mxu1 %v2824_v51 }
 0x248   :  { %928 = vmatprep.subr.mxu0 %v2721_v25  ;;  %2178 = vmatprep.subr.mxu1 %v3633_v47 }
 0x249   :  { %929 = vmatpush1.msra.mxu0 %v2724_v26  ;;  %2179 = vmatpush3.msra.mxu1 %v2832_v52 }
 0x24a   :  { %930 = vmatprep.subr.mxu0 %v2728_v27  ;;  %2180 = vmatprep.subr.mxu1 %v3633_v47 }
 0x24b   :  { %931 = vmatpush1.msra.mxu0 %v2736_v29  ;;  %2181 = vmatpush3.msra.mxu1 %v2838_v53 }
 0x24c   :  { %932 = vmatprep.subr.mxu0 %v2745_v31  ;;  %2182 = vmatprep.subr.mxu1 %v3633_v47 }
 0x24d   :  { %933 = vmatpush1.msra.mxu0 %v2748_v32  ;;  %2183 = vmatpush3.msra.mxu1 %v2845_v54 }
 0x24e   :  { %934 = vmatprep.subr.mxu0 %v2752_v33  ;;  %2184 = vmatprep.subr.mxu1 %v3633_v47 }
 0x24f   :  { %935 = vmatpush1.msra.mxu0 %v2760_v35  ;;  %2185 = vmatpush3.msra.mxu1 %v2851_v55 }
 0x250   :  { %936 = vmatprep.subr.mxu0 %v2767_v37  ;;  %2186 = vmatprep.subr.mxu1 %v3633_v47 }
 0x251   :  { %937 = vmatpush1.msra.mxu0 %v2770_v38  ;;  %2187 = vmatpush3.msra.mxu1 %v2858_v56 }
 0x252   :  { %938 = vmatprep.subr.mxu0 %v2774_v39  ;;  %2188 = vmatprep.subr.mxu1 %v3633_v47 }
 0x253   :  { %939 = vmatpush1.msra.mxu0 %v2781_v41  ;;  %2189 = vmatpush3.msra.mxu1 %v2864_v57 }
 0x254   :  { %940 = vmatprep.subr.mxu0 %v2788_v43  ;;  %2190 = vmatprep.subr.mxu1 %v3633_v47 }
 0x255   :  { %941 = vmatpush1.msra.mxu0 %v3642_v44  ;;  %2191 = vmatpush3.msra.mxu1 %v3643_v63 }
 0x256   :  { %942 = vmatprep.subr.mxu0 %v3644_v42  ;;  %2192 = vmatprep.subr.mxu1 %v3633_v47  ;;  %v3650_v42 = vld [vmem:[#allocation34_spill] sm:$0xff] }
 0x257   :  { %943 = vmatpush1.msra.mxu0 %v3645_v60  ;;  %976 = vmatprep.mubr.f32.mxu0 %v3633_v47 }
 0x258   :  { %2193 = vmatpush3.msra.mxu1 %v3646_v1  ;;  %2194 = vmatprep.mubr.msk.f32.mxu1 %vm2584_vm2, %v3633_v47 }
 0x259   :  { %1077 = vmatprep.subr.mxu0 %v3647_v58  ;;  %2197 = vmatprep.subr.mxu1 %v3633_v47 }
 0x2f8   :  { %v813_v36 = vpop.f32.mrf.mxu0  ;;  %v884_v24 = vpop.f32.mrf.mxu1 }
 0x2f9   :  { %v888_v17 = vadd.f32 %v813_v36, %v3648_v59  ;;  %v902_v58 = vadd.f32 %v2988_v3, %v884_v24  ;;  %v3248_v24 = vld [vmem:[#allocation3 + $0x148] sm:$0xff] }
 0x2fa   :  { %v2161_v4 = vpop.f32.mrf.mxu1  ;;  %v815_v19 = vpop.f32.mrf.mxu0 }
 0x2fb   :  { %v1868_v62 = vmul.f32 -1.442695, %v888_v17  ;;  %v895_v0 = vadd.f32 %v815_v19, %v3649_v45  ;;  %v3251_v19 = vld [vmem:[#allocation3 + $0x128] sm:$0xff]  ;;  %v3255_v45 = vld [vmem:[#allocation3 + $0x120] sm:$0xff] }
 0x2fd   :  { %2402 = vpow2.f32 %v1868_v62  ;;  %v1869_v2 = vmul.f32 -1.442695, %v895_v0  ;;  %v3259_v0 = vld [vmem:[#allocation3 + $0x110] sm:$0xff] }
 0x2ff   :  { %2404 = vpow2.f32 %v1869_v2  ;;  %v3263_v2 = vld [vmem:[#allocation3 + $0x108] sm:$0xff] }
 0x30a   :  { %v2403_v8 = vpop.eup %2402 }
 0x30b   :  { %v892_v61 = vadd.f32 1.0, %v2403_v8  ;;  %v3267_v8 = vld [vmem:[#allocation3 + $0xf8] sm:$0xff] }
 0x30c   :  { %v2405_v13 = vpop.eup %2404 }
 0x30d   :  { %2406 = vrcp.f32 %v892_v61  ;;  %v899_v44 = vadd.f32 1.0, %v2405_v13  ;;  %v3271_v61 = vld [vmem:[#allocation3 + $0xf0] sm:$0xff]  ;;  %v3279_v13 = vld [vmem:[#allocation3 + $0xd8] sm:$0xff] }
 0x31a   :  { %v2407_v1 = vpop.eup %2406 }
 0x31b   :  { %v903_v60 = vmul.f32 %v2407_v1, %v902_v58  ;;  %v3245_v1 = vld [vmem:[#allocation3 + $0x138] sm:$0xff]  ;;  %v3287_v58 = vld [vmem:[#allocation3 + $0xc0] sm:$0xff] }
 0x31d   :  { %v904_v63 = vadd.f32 %v903_v60, %v3650_v42  ;;  %v3238_v42 = vld [vmem:[#allocation3 + $0x160] sm:$0xff] }
 0x31e   :  { %v3241_v60 = vld [vmem:[#allocation3 + $0x140] sm:$0xff] }
 0x31f   :  { %2408 = vtanh.f32 %v904_v63  ;;  %v3235_v63 = vld [vmem:[#allocation3 + $0x150] sm:$0xff] }
 0x320   :  { %2410 = vrcp.f32 %v899_v44  ;;  %v3231_v44 = vld [vmem:[#allocation3 + $0x158] sm:$0xff] }
 0x32c   :  { %v2409_v36 = vpop.eup %2408 }
 0x32d   :  { %v906_v59 = vsub.f32 %v3067_v30, %v2409_v36  ;;  %v2411_v17 = vpop.eup %2410  ;;  %v3228_v30 = vld [vmem:[#allocation3 + $0x178] sm:$0xff] }
 0x32f   :  { %v907_v4 = vmul.f32 %v2411_v17, %v906_v59  ;;  %v3303_v59 = vld [vmem:[#allocation3 + $0x90] sm:$0xff]  ;;  %v3311_v17 = vld [vmem:[#allocation3 + $0x78] sm:$0xff] }
 0x331   :  { %v3143_v62 = vadd.f32 %v2409_v36, %v907_v4  ;;  %v3295_v36 = vld [vmem:[#allocation3 + $0xa8] sm:$0xff]  ;;  %v3319_v4 = vld [vmem:[#allocation3 + $0x60] sm:$0xff] }
 0x333   :  { %977 = vmatmul.mubr.f32.vlgmr.msra.gmra.mxu0 %v3143_v62  ;;  %2195 = vmatmul.mubr.f32.vlgmr.msra.gmra.mxu1 %v3143_v62 }
 0x334   :  { %1078 = vmatpush1.msra.mxu0 %v2643_v5  ;;  %2198 = vmatpush3.msra.mxu1 %v2731_v28  ;;  %v3651_v5 = vld [vmem:[#allocation13_spill] sm:$0xff] }
 0x335   :  { %1079 = vmatprep.subr.mxu0 %v2646_v6  ;;  %2199 = vmatprep.subr.mxu1 %v3633_v47  ;;  %v3652_v6 = vld [vmem:[#allocation16_spill] sm:$0xff] }
 0x336   :  { %1080 = vmatpush1.msra.mxu0 %v2650_v7  ;;  %2200 = vmatpush3.msra.mxu1 %v2755_v34  ;;  %v3653_v7 = vld [vmem:[#allocation14_spill] sm:$0xff] }
 0x337   :  { %1081 = vmatprep.subr.mxu0 %v2657_v9  ;;  %2201 = vmatprep.subr.mxu1 %v3633_v47  ;;  %v3654_v9 = vld [vmem:[#allocation15_spill] sm:$0xff] }
 0x338   :  { %1082 = vmatpush1.msra.mxu0 %v2660_v10  ;;  %2202 = vmatpush3.msra.mxu1 %v2777_v40  ;;  %v3655_v10 = vld [vmem:[#allocation17_spill] sm:$0xff] }
 0x339   :  { %1083 = vmatprep.subr.mxu0 %v2663_v11  ;;  %2203 = vmatprep.subr.mxu1 %v3633_v47  ;;  %v3212_v11 = vld [vmem:[#allocation3 + $0x170] sm:$0xff] }
 0x33a   :  { %1084 = vmatpush1.msra.mxu0 %v2667_v12  ;;  %2204 = vmatpush3.msra.mxu1 %v2798_v46 }
 0x33b   :  { %1085 = vmatprep.subr.mxu0 %v2676_v14  ;;  %2205 = vmatprep.subr.mxu1 %v3633_v47 }
 0x33c   :  { %1086 = vmatpush1.msra.mxu0 %v2679_v15  ;;  %2206 = vmatpush3.msra.mxu1 %v2806_v48  ;;  %v3656_v15 = vld [vmem:[#allocation22_spill] sm:$0xff] }
 0x33d   :  { %1087 = vmatprep.subr.mxu0 %v2682_v16  ;;  %2207 = vmatprep.subr.mxu1 %v3633_v47 }
 0x33e   :  { %1088 = vmatpush1.msra.mxu0 %v2690_v18  ;;  %2208 = vmatpush3.msra.mxu1 %v2812_v49 }
 0x33f   :  { %1089 = vmatprep.subr.mxu0 %v2699_v20  ;;  %2209 = vmatprep.subr.mxu1 %v3633_v47 }
 0x340   :  { %1090 = vmatpush1.msra.mxu0 %v2702_v21  ;;  %2210 = vmatpush3.msra.mxu1 %v2817_v50 }
 0x341   :  { %1091 = vmatprep.subr.mxu0 %v2706_v22  ;;  %2211 = vmatprep.subr.mxu1 %v3633_v47  ;;  %v3657_v22 = vld [vmem:[#allocation23_spill] sm:$0xff] }
 0x342   :  { %1092 = vmatpush1.msra.mxu0 %v2712_v23  ;;  %2212 = vmatpush3.msra.mxu1 %v2824_v51 }
 0x343   :  { %1093 = vmatprep.subr.mxu0 %v2721_v25  ;;  %2213 = vmatprep.subr.mxu1 %v3633_v47 }
 0x344   :  { %1094 = vmatpush1.msra.mxu0 %v2724_v26  ;;  %2214 = vmatpush3.msra.mxu1 %v2832_v52 }
 0x345   :  { %1095 = vmatprep.subr.mxu0 %v2728_v27  ;;  %2215 = vmatprep.subr.mxu1 %v3633_v47 }
 0x346   :  { %1096 = vmatpush1.msra.mxu0 %v2736_v29  ;;  %2216 = vmatpush3.msra.mxu1 %v2838_v53 }
 0x347   :  { %1097 = vmatprep.subr.mxu0 %v2745_v31  ;;  %2217 = vmatprep.subr.mxu1 %v3633_v47 }
 0x348   :  { %1098 = vmatpush1.msra.mxu0 %v2748_v32  ;;  %2218 = vmatpush3.msra.mxu1 %v2845_v54 }
 0x349   :  { %1099 = vmatprep.subr.mxu0 %v2752_v33  ;;  %2219 = vmatprep.subr.mxu1 %v3633_v47  ;;  %v3658_v33 = vld [vmem:[#allocation33_spill] sm:$0xff] }
 0x34a   :  { %1100 = vmatpush1.msra.mxu0 %v2760_v35  ;;  %2220 = vmatpush3.msra.mxu1 %v2851_v55 }
 0x34b   :  { %1101 = vmatprep.subr.mxu0 %v2767_v37  ;;  %2221 = vmatprep.subr.mxu1 %v3633_v47 }
 0x34c   :  { %1102 = vmatpush1.msra.mxu0 %v2770_v38  ;;  %2222 = vmatpush3.msra.mxu1 %v2858_v56 }
 0x34d   :  { %1103 = vmatprep.subr.mxu0 %v2774_v39  ;;  %2223 = vmatprep.subr.mxu1 %v3633_v47 }
 0x34e   :  { %1104 = vmatpush1.msra.mxu0 %v2781_v41  ;;  %2224 = vmatpush3.msra.mxu1 %v2864_v57 }
 0x34f   :  { %1105 = vmatprep.subr.mxu0 %v2788_v43  ;;  %2225 = vmatprep.subr.mxu1 %v3633_v47  ;;  %v3225_v43 = vld [vmem:[#allocation3 + $0x168] sm:$0xff] }
 0x350   :  { %1106 = vmatpush1.msra.mxu0 %v3651_v5  ;;  %2226 = vmatpush3.msra.mxu1 %v3652_v6  ;;  %v3335_v5 = vld [vmem:[#allocation3 + $0x30] sm:$0xff] }
 0x351   :  { %1107 = vmatprep.subr.mxu0 %v3653_v7  ;;  %2227 = vmatprep.subr.mxu1 %v3633_v47  ;;  %v3343_v7 = vld [vmem:[#allocation3 + $0x18] sm:$0xff] }
 0x352   :  { %1108 = vmatpush1.msra.mxu0 %v3654_v9  ;;  %1141 = vmatprep.mubr.f32.mxu0 %v3633_v47  ;;  %3659 = vst [vmem:[#allocation18_spill] sm:$0xff] %v3343_v7  ;;  %v3351_v9 = vld [vmem:[#allocation3] sm:$0xff] }
 0x353   :  { %2228 = vmatpush3.msra.mxu1 %v3655_v10  ;;  %2229 = vmatprep.mubr.msk.f32.mxu1 %vm2584_vm2, %v3633_v47  ;;  %3661 = vst [vmem:[#allocation24_spill] sm:$0xff] %v3351_v9 }
 0x354   :  { %1242 = vmatprep.subr.mxu0 %v3212_v11  ;;  %2232 = vmatprep.subr.mxu1 %v3633_v47 }
 0x3f3   :  { %v978_v12 = vpop.f32.mrf.mxu0  ;;  %v1049_v14 = vpop.f32.mrf.mxu1 }
 0x3f4   :  { %v1053_v16 = vadd.f32 %v978_v12, %v3656_v15  ;;  %v1067_v29 = vadd.f32 %v2988_v3, %v1049_v14  ;;  %v3662_v12 = vld [vmem:[#allocation25_spill] sm:$0xff] }
 0x3f5   :  { %v2196_v18 = vpop.f32.mrf.mxu1  ;;  %v980_v21 = vpop.f32.mrf.mxu0 }
 0x3f6   :  { %v1870_v20 = vmul.f32 -1.442695, %v1053_v16  ;;  %v1060_v23 = vadd.f32 %v980_v21, %v3657_v22 }
 0x3f8   :  { %2412 = vpow2.f32 %v1870_v20  ;;  %v1871_v25 = vmul.f32 -1.442695, %v1060_v23  ;;  %v3663_v20 = vld [vmem:[#allocation26_spill] sm:$0xff] }
 0x3fa   :  { %2414 = vpow2.f32 %v1871_v25 }
 0x405   :  { %v2413_v26 = vpop.eup %2412 }
 0x406   :  { %v1057_v27 = vadd.f32 1.0, %v2413_v26 }
 0x407   :  { %v2415_v28 = vpop.eup %2414 }
 0x408   :  { %2416 = vrcp.f32 %v1057_v27  ;;  %v1064_v35 = vadd.f32 1.0, %v2415_v28 }
 0x415   :  { %v2417_v31 = vpop.eup %2416 }
 0x416   :  { %v1068_v32 = vmul.f32 %v2417_v31, %v1067_v29  ;;  %v3664_v29 = vld [vmem:[#allocation36_spill] sm:$0xff] }
 0x418   :  { %v1069_v34 = vadd.f32 %v1068_v32, %v3658_v33 }
 0x41a   :  { %2418 = vtanh.f32 %v1069_v34 }
 0x41b   :  { %2420 = vrcp.f32 %v1064_v35 }
 0x427   :  { %v2419_v37 = vpop.eup %2418 }
 0x428   :  { %v1071_v38 = vsub.f32 %v3143_v62, %v2419_v37  ;;  %v2421_v39 = vpop.eup %2420  ;;  %v3327_v62 = vld [vmem:[#allocation3 + $0x48] sm:$0xff] }
 0x42a   :  { %v1072_v40 = vmul.f32 %v2421_v39, %v1071_v38  ;;  %v3382_v39 = vld [vmem:[#allocation3 + $0x130] sm:$0xff] }
 0x42c   :  { %v3221_v41 = vadd.f32 %v2419_v37, %v1072_v40  ;;  %v3388_v40 = vld [vmem:[#allocation3 + $0x118] sm:$0xff] }
 0x42e   :  { %1142 = vmatmul.mubr.f32.vlgmr.msra.gmra.mxu0 %v3221_v41  ;;  %2230 = vmatmul.mubr.f32.vlgmr.msra.gmra.mxu1 %v3221_v41 }
 0x42f   :  { %1243 = vmatpush1.msra.mxu0 %v3225_v43  ;;  %2233 = vmatpush3.msra.mxu1 %v3228_v30 }
 0x430   :  { %1244 = vmatprep.subr.mxu0 %v3231_v44  ;;  %2234 = vmatprep.subr.mxu1 %v3633_v47 }
 0x431   :  { %1245 = vmatpush1.msra.mxu0 %v3235_v63  ;;  %2235 = vmatpush3.msra.mxu1 %v3238_v42 }
 0x432   :  { %1246 = vmatprep.subr.mxu0 %v3241_v60  ;;  %2236 = vmatprep.subr.mxu1 %v3633_v47 }
 0x433   :  { %1247 = vmatpush1.msra.mxu0 %v3245_v1  ;;  %2237 = vmatpush3.msra.mxu1 %v3248_v24 }
 0x434   :  { %1248 = vmatprep.subr.mxu0 %v3251_v19  ;;  %2238 = vmatprep.subr.mxu1 %v3633_v47 }
 0x435   :  { %1249 = vmatpush1.msra.mxu0 %v3255_v45  ;;  %2239 = vmatpush3.msra.mxu1 %v2798_v46  ;;  %v3275_v46 = vld [vmem:[#allocation3 + $0xe0] sm:$0xff] }
 0x436   :  { %1250 = vmatprep.subr.mxu0 %v3259_v0  ;;  %2240 = vmatprep.subr.mxu1 %v3633_v47 }
 0x437   :  { %1251 = vmatpush1.msra.mxu0 %v3263_v2  ;;  %2241 = vmatpush3.msra.mxu1 %v2806_v48  ;;  %v3283_v48 = vld [vmem:[#allocation3 + $0xc8] sm:$0xff] }
 0x438   :  { %1252 = vmatprep.subr.mxu0 %v3267_v8  ;;  %2242 = vmatprep.subr.mxu1 %v3633_v47 }
 0x439   :  { %1253 = vmatpush1.msra.mxu0 %v3271_v61  ;;  %2243 = vmatpush3.msra.mxu1 %v2812_v49  ;;  %v3291_v49 = vld [vmem:[#allocation3 + $0xb0] sm:$0xff] }
 0x43a   :  { %1254 = vmatprep.subr.mxu0 %v3275_v46  ;;  %2244 = vmatprep.subr.mxu1 %v3633_v47 }
 0x43b   :  { %1255 = vmatpush1.msra.mxu0 %v3279_v13  ;;  %2245 = vmatpush3.msra.mxu1 %v2817_v50  ;;  %v3299_v50 = vld [vmem:[#allocation3 + $0x98] sm:$0xff] }
 0x43c   :  { %1256 = vmatprep.subr.mxu0 %v3283_v48  ;;  %2246 = vmatprep.subr.mxu1 %v3633_v47 }
 0x43d   :  { %1257 = vmatpush1.msra.mxu0 %v3287_v58  ;;  %2247 = vmatpush3.msra.mxu1 %v2824_v51  ;;  %v3307_v51 = vld [vmem:[#allocation3 + $0x80] sm:$0xff] }
 0x43e   :  { %1258 = vmatprep.subr.mxu0 %v3291_v49  ;;  %2248 = vmatprep.subr.mxu1 %v3633_v47 }
 0x43f   :  { %1259 = vmatpush1.msra.mxu0 %v3295_v36  ;;  %2249 = vmatpush3.msra.mxu1 %v2832_v52  ;;  %v3315_v52 = vld [vmem:[#allocation3 + $0x68] sm:$0xff] }
 0x440   :  { %1260 = vmatprep.subr.mxu0 %v3299_v50  ;;  %2250 = vmatprep.subr.mxu1 %v3633_v47 }
 0x441   :  { %1261 = vmatpush1.msra.mxu0 %v3303_v59  ;;  %2251 = vmatpush3.msra.mxu1 %v2838_v53  ;;  %v3323_v53 = vld [vmem:[#allocation3 + $0x50] sm:$0xff] }
 0x442   :  { %1262 = vmatprep.subr.mxu0 %v3307_v51  ;;  %2252 = vmatprep.subr.mxu1 %v3633_v47 }
 0x443   :  { %1263 = vmatpush1.msra.mxu0 %v3311_v17  ;;  %2253 = vmatpush3.msra.mxu1 %v2845_v54  ;;  %v3331_v54 = vld [vmem:[#allocation3 + $0x38] sm:$0xff] }
 0x444   :  { %1264 = vmatprep.subr.mxu0 %v3315_v52  ;;  %2254 = vmatprep.subr.mxu1 %v3633_v47 }
 0x445   :  { %1265 = vmatpush1.msra.mxu0 %v3319_v4  ;;  %2255 = vmatpush3.msra.mxu1 %v2851_v55  ;;  %v3339_v55 = vld [vmem:[#allocation3 + $0x20] sm:$0xff] }
 0x446   :  { %1266 = vmatprep.subr.mxu0 %v3323_v53  ;;  %2256 = vmatprep.subr.mxu1 %v3633_v47 }
 0x447   :  { %1267 = vmatpush1.msra.mxu0 %v3327_v62  ;;  %2257 = vmatpush3.msra.mxu1 %v2858_v56  ;;  %v3347_v56 = vld [vmem:[#allocation3 + $0x8] sm:$0xff] }
 0x448   :  { %1268 = vmatprep.subr.mxu0 %v3331_v54  ;;  %2258 = vmatprep.subr.mxu1 %v3633_v47  ;;  %3660 = vst [vmem:[#allocation19_spill] sm:$0xff] %v3347_v56 }
 0x449   :  { %1269 = vmatpush1.msra.mxu0 %v3335_v5  ;;  %2259 = vmatpush3.msra.mxu1 %v2864_v57 }
 0x44a   :  { %1270 = vmatprep.subr.mxu0 %v3339_v55  ;;  %2260 = vmatprep.subr.mxu1 %v3633_v47 }
 0x44b   :  { %1271 = vmatpush1.msra.mxu0 %v3343_v7  ;;  %2261 = vmatpush3.msra.mxu1 %v3652_v6 }
 0x44c   :  { %1272 = vmatprep.subr.mxu0 %v3347_v56  ;;  %2262 = vmatprep.subr.mxu1 %v3633_v47 }
 0x44d   :  { %1273 = vmatpush1.msra.mxu0 %v3351_v9  ;;  %1306 = vmatprep.mubr.f32.mxu0 %v3633_v47 }
 0x44e   :  { %2263 = vmatpush3.msra.mxu1 %v3655_v10  ;;  %2264 = vmatprep.mubr.msk.f32.mxu1 %vm2584_vm2, %v3633_v47 }
 0x44f   :  { %1407 = vmatprep.subr.mxu0 %v3212_v11  ;;  %2267 = vmatprep.subr.mxu1 %v3633_v47 }
 0x4ee   :  { %v1143_v57 = vpop.f32.mrf.mxu0  ;;  %v1214_v6 = vpop.f32.mrf.mxu1 }
 0x4ef   :  { %v1218_v14 = vadd.f32 %v1143_v57, %v3662_v12  ;;  %v1232_v26 = vadd.f32 %v2988_v3, %v1214_v6  ;;  %v3400_v57 = vld [vmem:[#allocation3 + $0xe8] sm:$0xff]  ;;  %v3406_v6 = vld [vmem:[#allocation3 + $0xd0] sm:$0xff]  ;;  %v3412_v12 = vld [vmem:[#allocation3 + $0xb8] sm:$0xff] }
 0x4f0   :  { %v2231_v15 = vpop.f32.mrf.mxu1  ;;  %v1145_v18 = vpop.f32.mrf.mxu0 }
 0x4f1   :  { %v1872_v16 = vmul.f32 -1.442695, %v1218_v14  ;;  %v1225_v21 = vadd.f32 %v1145_v18, %v3663_v20  ;;  %v3418_v14 = vld [vmem:[#allocation3 + $0xa0] sm:$0xff]  ;;  %v3424_v15 = vld [vmem:[#allocation3 + $0x88] sm:$0xff]  ;;  %v3436_v18 = vld [vmem:[#allocation3 + $0x58] sm:$0xff] }
 0x4f2   :  { %v3442_v20 = vld [vmem:[#allocation3 + $0x40] sm:$0xff] }
 0x4f3   :  { %2422 = vpow2.f32 %v1872_v16  ;;  %v1873_v22 = vmul.f32 -1.442695, %v1225_v21  ;;  %v3430_v16 = vld [vmem:[#allocation3 + $0x70] sm:$0xff]  ;;  %v3448_v21 = vld [vmem:[#allocation3 + $0x28] sm:$0xff] }
 0x4f4   :  { %3665 = vst [vmem:[#allocation12_spill] sm:$0xff] %v3448_v21 }
 0x4f5   :  { %2424 = vpow2.f32 %v1873_v22  ;;  %v3455_v22 = vld [vmem:[#allocation3 + $0x10] sm:$0xff] }
 0x4f6   :  { %3666 = vst [vmem:[#allocation20_spill] sm:$0xff] %v3455_v22 }
 0x500   :  { %v2423_v23 = vpop.eup %2422 }
 0x501   :  { %v1222_v10 = vadd.f32 1.0, %v2423_v23 }
 0x502   :  { %v2425_v25 = vpop.eup %2424 }
 0x503   :  { %2426 = vrcp.f32 %v1222_v10  ;;  %v1229_v32 = vadd.f32 1.0, %v2425_v25  ;;  %v3667_v25 = vld [vmem:[#allocation27_spill] sm:$0xff] }
 0x510   :  { %v2427_v27 = vpop.eup %2426 }
 0x511   :  { %v1233_v28 = vmul.f32 %v2427_v27, %v1232_v26 }
 0x513   :  { %v1234_v31 = vadd.f32 %v1233_v28, %v3664_v29 }
 0x515   :  { %2428 = vtanh.f32 %v1234_v31  ;;  %v3668_v31 = vld [vmem:[#allocation28_spill] sm:$0xff] }
 0x516   :  { %2430 = vrcp.f32 %v1229_v32 }
 0x522   :  { %v2429_v33 = vpop.eup %2428 }
 0x523   :  { %v1236_v34 = vsub.f32 %v3221_v41, %v2429_v33  ;;  %v2431_v35 = vpop.eup %2430  ;;  %v3394_v41 = vld [vmem:[#allocation3 + $0x100] sm:$0xff] }
 0x525   :  { %v1237_v37 = vmul.f32 %v2431_v35, %v1236_v34 }
 0x527   :  { %v3365_v38 = vadd.f32 %v2429_v33, %v1237_v37 }
 0x529   :  { %1307 = vmatmul.mubr.f32.vlgmr.msra.gmra.mxu0 %v3365_v38  ;;  %2265 = vmatmul.mubr.f32.vlgmr.msra.gmra.mxu1 %v3365_v38 }
 0x52a   :  { %1408 = vmatpush1.msra.mxu0 %v3225_v43  ;;  %2268 = vmatpush3.msra.mxu1 %v3228_v30 }
 0x52b   :  { %1409 = vmatprep.subr.mxu0 %v3231_v44  ;;  %2269 = vmatprep.subr.mxu1 %v3633_v47 }
 0x52c   :  { %1410 = vmatpush1.msra.mxu0 %v3235_v63  ;;  %2270 = vmatpush3.msra.mxu1 %v3238_v42 }
 0x52d   :  { %1411 = vmatprep.subr.mxu0 %v3241_v60  ;;  %2271 = vmatprep.subr.mxu1 %v3633_v47 }
 0x52e   :  { %1412 = vmatpush1.msra.mxu0 %v3245_v1  ;;  %2272 = vmatpush3.msra.mxu1 %v3248_v24 }
 0x52f   :  { %1413 = vmatprep.subr.mxu0 %v3251_v19  ;;  %2273 = vmatprep.subr.mxu1 %v3633_v47 }
 0x530   :  { %1414 = vmatpush1.msra.mxu0 %v3255_v45  ;;  %2274 = vmatpush3.msra.mxu1 %v3382_v39 }
 0x531   :  { %1415 = vmatprep.subr.mxu0 %v3259_v0  ;;  %2275 = vmatprep.subr.mxu1 %v3633_v47 }
 0x532   :  { %1416 = vmatpush1.msra.mxu0 %v3263_v2  ;;  %2276 = vmatpush3.msra.mxu1 %v3388_v40 }
 0x533   :  { %1417 = vmatprep.subr.mxu0 %v3267_v8  ;;  %2277 = vmatprep.subr.mxu1 %v3633_v47 }
 0x534   :  { %1418 = vmatpush1.msra.mxu0 %v3271_v61  ;;  %2278 = vmatpush3.msra.mxu1 %v3394_v41 }
 0x535   :  { %1419 = vmatprep.subr.mxu0 %v3275_v46  ;;  %2279 = vmatprep.subr.mxu1 %v3633_v47 }
 0x536   :  { %1420 = vmatpush1.msra.mxu0 %v3279_v13  ;;  %2280 = vmatpush3.msra.mxu1 %v3400_v57 }
 0x537   :  { %1421 = vmatprep.subr.mxu0 %v3283_v48  ;;  %2281 = vmatprep.subr.mxu1 %v3633_v47 }
 0x538   :  { %1422 = vmatpush1.msra.mxu0 %v3287_v58  ;;  %2282 = vmatpush3.msra.mxu1 %v3406_v6 }
 0x539   :  { %1423 = vmatprep.subr.mxu0 %v3291_v49  ;;  %2283 = vmatprep.subr.mxu1 %v3633_v47 }
 0x53a   :  { %1424 = vmatpush1.msra.mxu0 %v3295_v36  ;;  %2284 = vmatpush3.msra.mxu1 %v3412_v12 }
 0x53b   :  { %1425 = vmatprep.subr.mxu0 %v3299_v50  ;;  %2285 = vmatprep.subr.mxu1 %v3633_v47 }
 0x53c   :  { %1426 = vmatpush1.msra.mxu0 %v3303_v59  ;;  %2286 = vmatpush3.msra.mxu1 %v3418_v14 }
 0x53d   :  { %1427 = vmatprep.subr.mxu0 %v3307_v51  ;;  %2287 = vmatprep.subr.mxu1 %v3633_v47 }
 0x53e   :  { %1428 = vmatpush1.msra.mxu0 %v3311_v17  ;;  %2288 = vmatpush3.msra.mxu1 %v3424_v15 }
 0x53f   :  { %1429 = vmatprep.subr.mxu0 %v3315_v52  ;;  %2289 = vmatprep.subr.mxu1 %v3633_v47 }
 0x540   :  { %1430 = vmatpush1.msra.mxu0 %v3319_v4  ;;  %2290 = vmatpush3.msra.mxu1 %v3430_v16 }
 0x541   :  { %1431 = vmatprep.subr.mxu0 %v3323_v53  ;;  %2291 = vmatprep.subr.mxu1 %v3633_v47 }
 0x542   :  { %1432 = vmatpush1.msra.mxu0 %v3327_v62  ;;  %2292 = vmatpush3.msra.mxu1 %v3436_v18 }
 0x543   :  { %1433 = vmatprep.subr.mxu0 %v3331_v54  ;;  %2293 = vmatprep.subr.mxu1 %v3633_v47 }
 0x544   :  { %1434 = vmatpush1.msra.mxu0 %v3335_v5  ;;  %2294 = vmatpush3.msra.mxu1 %v3442_v20 }
 0x545   :  { %1435 = vmatprep.subr.mxu0 %v3339_v55  ;;  %2295 = vmatprep.subr.mxu1 %v3633_v47 }
 0x546   :  { %1436 = vmatpush1.msra.mxu0 %v3343_v7  ;;  %2296 = vmatpush3.msra.mxu1 %v3448_v21 }
 0x547   :  { %1437 = vmatprep.subr.mxu0 %v3347_v56  ;;  %2297 = vmatprep.subr.mxu1 %v3633_v47  ;;  %v3669_v56 = vld [vmem:[#allocation35_spill] sm:$0xff] }
 0x548   :  { %1438 = vmatpush1.msra.mxu0 %v3351_v9  ;;  %1471 = vmatprep.mubr.f32.mxu0 %v3633_v47 }
 0x549   :  { %2298 = vmatpush3.msra.mxu1 %v3455_v22  ;;  %2299 = vmatprep.mubr.msk.f32.mxu1 %vm2584_vm2, %v3633_v47 }
 0x54a   :  { %1572 = vmatprep.subr.mxu0 %v3212_v11  ;;  %2302 = vmatprep.subr.mxu1 %v3633_v47 }
 0x5e9   :  { %v1308_v23 = vpop.f32.mrf.mxu0  ;;  %v1379_v10 = vpop.f32.mrf.mxu1 }
 0x5ea   :  { %v1383_v26 = vadd.f32 %v1308_v23, %v3667_v25  ;;  %v1397_v11 = vadd.f32 %v2988_v3, %v1379_v10  ;;  %v3670_v3 = vld [vmem:[#allocation18_spill] sm:$0xff] }
 0x5eb   :  { %v2266_v27 = vpop.f32.mrf.mxu1  ;;  %v1310_v29 = vpop.f32.mrf.mxu0 }
 0x5ec   :  { %v1874_v28 = vmul.f32 -1.442695, %v1383_v26  ;;  %v1390_v32 = vadd.f32 %v1310_v29, %v3668_v31 }
 0x5ee   :  { %2432 = vpow2.f32 %v1874_v28  ;;  %v1875_v33 = vmul.f32 -1.442695, %v1390_v32 }
 0x5f0   :  { %2434 = vpow2.f32 %v1875_v33  ;;  %v3679_v33 = vld [vmem:[#allocation32_spill] sm:$0xff] }
 0x5fb   :  { %v2433_v34 = vpop.eup %2432 }
 0x5fc   :  { %v1387_v35 = vadd.f32 1.0, %v2433_v34 }
 0x5fd   :  { %v2435_v37 = vpop.eup %2434 }
 0x5fe   :  { %2436 = vrcp.f32 %v1387_v35  ;;  %v1394_v7 = vadd.f32 1.0, %v2435_v37 }
 0x60b   :  { %v2437_v22 = vpop.eup %2436 }
 0x60c   :  { %v1398_v9 = vmul.f32 %v2437_v22, %v1397_v11  ;;  %v3678_v22 = vld [vmem:[#allocation31_spill] sm:$0xff] }
 0x60e   :  { %v1399_v21 = vadd.f32 %v1398_v9, %v3669_v56  ;;  %v1746_v56 = vld [vmem:[#allocation6 + $0x60] sm:$0xff]  ;;  %v1745_v9 = vld [vmem:[#allocation6 + $0x58] sm:$0xff] }
 0x610   :  { %2438 = vtanh.f32 %v1399_v21 }
 0x611   :  { %2440 = vrcp.f32 %v1394_v7  ;;  %v1747_v7 = vld [vmem:[#allocation6 + $0x68] sm:$0xff] }
 0x61d   :  { %v2439_v23 = vpop.eup %2438 }
 0x61e   :  { %v1401_v25 = vsub.f32 %v3365_v38, %v2439_v23  ;;  %v2441_v26 = vpop.eup %2440  ;;  %v1744_v38 = vld [vmem:[#allocation6 + $0x50] sm:$0xff] }
 0x620   :  { %v1402_v27 = vmul.f32 %v2441_v26, %v1401_v25 }
 0x622   :  { %v3467_v28 = vadd.f32 %v2439_v23, %v1402_v27  ;;  %v3680_v27 = vld [vmem:[#allocation37_spill] sm:$0xff] }
 0x624   :  { %1472 = vmatmul.mubr.f32.vlgmr.msra.gmra.mxu0 %v3467_v28  ;;  %2300 = vmatmul.mubr.f32.vlgmr.msra.gmra.mxu1 %v3467_v28 }
 0x625   :  { %1573 = vmatpush1.msra.mxu0 %v3225_v43  ;;  %2303 = vmatpush3.msra.mxu1 %v3228_v30  ;;  %v3671_v43 = vld [vmem:[#allocation12_spill] sm:$0xff]  ;;  %v3672_v30 = vld [vmem:[#allocation19_spill] sm:$0xff] }
 0x626   :  { %1574 = vmatprep.subr.mxu0 %v3231_v44  ;;  %2304 = vmatprep.subr.mxu1 %v3633_v47  ;;  %v3673_v44 = vld [vmem:[#allocation24_spill] sm:$0xff] }
 0x627   :  { %1575 = vmatpush1.msra.mxu0 %v3235_v63  ;;  %2305 = vmatpush3.msra.mxu1 %v3238_v42  ;;  %v3674_v63 = vld [vmem:[#allocation20_spill] sm:$0xff] }
 0x628   :  { %1576 = vmatprep.subr.mxu0 %v3241_v60  ;;  %2306 = vmatprep.subr.mxu1 %v3633_v47 }
 0x629   :  { %1577 = vmatpush1.msra.mxu0 %v3245_v1  ;;  %2307 = vmatpush3.msra.mxu1 %v3248_v24  ;;  %v3675_v1 = vld [vmem:[#allocation29_spill] sm:$0xff] }
 0x62a   :  { %1578 = vmatprep.subr.mxu0 %v3251_v19  ;;  %2308 = vmatprep.subr.mxu1 %v3633_v47 }
 0x62b   :  { %1579 = vmatpush1.msra.mxu0 %v3255_v45  ;;  %2309 = vmatpush3.msra.mxu1 %v3382_v39  ;;  %v1743_v39 = vld [vmem:[#allocation6 + $0x48] sm:$0xff] }
 0x62c   :  { %1580 = vmatprep.subr.mxu0 %v3259_v0  ;;  %2310 = vmatprep.subr.mxu1 %v3633_v47 }
 0x62d   :  { %1581 = vmatpush1.msra.mxu0 %v3263_v2  ;;  %2311 = vmatpush3.msra.mxu1 %v3388_v40  ;;  %v3676_v2 = vld [vmem:[#allocation30_spill] sm:$0xff]  ;;  %v1742_v40 = vld [vmem:[#allocation6 + $0x40] sm:$0xff] }
 0x62e   :  { %1582 = vmatprep.subr.mxu0 %v3267_v8  ;;  %2312 = vmatprep.subr.mxu1 %v3633_v47 }
 0x62f   :  { %1583 = vmatpush1.msra.mxu0 %v3271_v61  ;;  %2313 = vmatpush3.msra.mxu1 %v3394_v41  ;;  %v1741_v41 = vld [vmem:[#allocation6 + $0x38] sm:$0xff] }
 0x630   :  { %1584 = vmatprep.subr.mxu0 %v3275_v46  ;;  %2314 = vmatprep.subr.mxu1 %v3633_v47 }
 0x631   :  { %1585 = vmatpush1.msra.mxu0 %v3279_v13  ;;  %2315 = vmatpush3.msra.mxu1 %v3400_v57  ;;  %v1740_v57 = vld [vmem:[#allocation6 + $0x30] sm:$0xff] }
 0x632   :  { %1586 = vmatprep.subr.mxu0 %v3283_v48  ;;  %2316 = vmatprep.subr.mxu1 %v3633_v47 }
 0x633   :  { %1587 = vmatpush1.msra.mxu0 %v3287_v58  ;;  %2317 = vmatpush3.msra.mxu1 %v3406_v6  ;;  %v3542_v58 = vld [vmem:[%s3583_s4] ss:$0 sm:$0xff]  ;;  %v1739_v6 = vld [vmem:[#allocation6 + $0x28] sm:$0xff] }
 0x634   :  { %1588 = vmatprep.subr.mxu0 %v3291_v49  ;;  %2318 = vmatprep.subr.mxu1 %v3633_v47 }
 0x635   :  { %1589 = vmatpush1.msra.mxu0 %v3295_v36  ;;  %2319 = vmatpush3.msra.mxu1 %v3412_v12  ;;  %v1738_v12 = vld [vmem:[#allocation6 + $0x20] sm:$0xff] }
 0x636   :  { %1590 = vmatprep.subr.mxu0 %v3299_v50  ;;  %2320 = vmatprep.subr.mxu1 %v3633_v47 }
 0x637   :  { %1591 = vmatpush1.msra.mxu0 %v3303_v59  ;;  %2321 = vmatpush3.msra.mxu1 %v3418_v14  ;;  %v3677_v59 = vld [vmem:[#allocation38_spill] sm:$0xff] }
 0x638   :  { %1592 = vmatprep.subr.mxu0 %v3307_v51  ;;  %2322 = vmatprep.subr.mxu1 %v3633_v47  ;;  %v1737_v14 = vld [vmem:[#allocation6 + $0x18] sm:$0xff] }
 0x639   :  { %1593 = vmatpush1.msra.mxu0 %v3311_v17  ;;  %2323 = vmatpush3.msra.mxu1 %v3424_v15  ;;  %v1736_v15 = vld [vmem:[#allocation6 + $0x10] sm:$0xff] }
 0x63a   :  { %1594 = vmatprep.subr.mxu0 %v3315_v52  ;;  %2324 = vmatprep.subr.mxu1 %v3633_v47 }
 0x63b   :  { %1595 = vmatpush1.msra.mxu0 %v3319_v4  ;;  %2325 = vmatpush3.msra.mxu1 %v3430_v16  ;;  %v1735_v16 = vld [vmem:[#allocation6 + $0x8] sm:$0xff] }
 0x63c   :  { %1596 = vmatprep.subr.mxu0 %v3323_v53  ;;  %2326 = vmatprep.subr.mxu1 %v3633_v47 }
 0x63d   :  { %1597 = vmatpush1.msra.mxu0 %v3327_v62  ;;  %2327 = vmatpush3.msra.mxu1 %v3436_v18  ;;  %v1734_v18 = vld [vmem:[#allocation6] sm:$0xff] }
 0x63e   :  { %1598 = vmatprep.subr.mxu0 %v3331_v54  ;;  %2328 = vmatprep.subr.mxu1 %v3633_v47 }
 0x63f   :  { %1599 = vmatpush1.msra.mxu0 %v3335_v5  ;;  %2329 = vmatpush3.msra.mxu1 %v3442_v20  ;;  %v1749_v5 = vld [vmem:[#allocation6 + $0x78] sm:$0xff] }
 0x640   :  { %1600 = vmatprep.subr.mxu0 %v3339_v55  ;;  %2330 = vmatprep.subr.mxu1 %v3633_v47  ;;  %v1748_v55 = vld [vmem:[#allocation6 + $0x70] sm:$0xff] }
 0x641   :  { %1601 = vmatpush1.msra.mxu0 %v3670_v3  ;;  %2331 = vmatpush3.msra.mxu1 %v3671_v43 }
 0x642   :  { %1602 = vmatprep.subr.mxu0 %v3672_v30  ;;  %2332 = vmatprep.subr.mxu1 %v3633_v47 }
 0x643   :  { %1603 = vmatpush1.msra.mxu0 %v3673_v44  ;;  %1636 = vmatprep.mubr.f32.mxu0 %v3633_v47 }
 0x644   :  { %2333 = vmatpush3.msra.mxu1 %v3674_v63  ;;  %2334 = vmatprep.mubr.msk.f32.mxu1 %vm2584_vm2, %v3633_v47 }
 0x645   :  { %2337 = vmatprep.subr.mxu0 %v3633_v47 }
 0x6e4   :  { %v1473_v42 = vpop.f32.mrf.mxu0  ;;  %v1544_v60 = vpop.f32.mrf.mxu1 }
 0x6e5   :  { %v1548_v24 = vadd.f32 %v1473_v42, %v3675_v1  ;;  %v1562_v49 = vadd.f32 %v3542_v58, %v1544_v60  ;;  %v1880_v60 = vld [vmem:[%s3585_s6] ss:$0 sm:$0xff] }
 0x6e6   :  { %v2301_v19 = vpop.f32.mrf.mxu1  ;;  %v1475_v0 = vpop.f32.mrf.mxu0 }
 0x6e7   :  { %v1876_v45 = vmul.f32 -1.442695, %v1548_v24  ;;  %v1555_v8 = vadd.f32 %v1475_v0, %v3676_v2 }
 0x6e9   :  { %2442 = vpow2.f32 %v1876_v45  ;;  %v1877_v61 = vmul.f32 -1.442695, %v1555_v8 }
 0x6eb   :  { %2444 = vpow2.f32 %v1877_v61 }
 0x6f6   :  { %v2443_v46 = vpop.eup %2442 }
 0x6f7   :  { %v1552_v13 = vadd.f32 1.0, %v2443_v46 }
 0x6f8   :  { %v2445_v48 = vpop.eup %2444 }
 0x6f9   :  { %2446 = vrcp.f32 %v1552_v13  ;;  %v1559_v17 = vadd.f32 1.0, %v2445_v48 }
 0x706   :  { %v2447_v36 = vpop.eup %2446 }
 0x707   :  { %v1563_v50 = vmul.f32 %v2447_v36, %v1562_v49 }
 0x709   :  { %v1564_v51 = vadd.f32 %v1563_v50, %v3677_v59 }
 0x70b   :  { %2448 = vtanh.f32 %v1564_v51 }
 0x70c   :  { %2450 = vrcp.f32 %v1559_v17 }
 0x718   :  { %v2449_v52 = vpop.eup %2448 }
 0x719   :  { %v1566_v4 = vsub.f32 %v3467_v28, %v2449_v52  ;;  %v2451_v53 = vpop.eup %2450 }
 0x71b   :  { %v1567_v62 = vmul.f32 %v2451_v53, %v1566_v4 }
 0x71d   :  { %v3547_v54 = vadd.f32 %v2449_v52, %v1567_v62 }
 0x71f   :  { %1637 = vmatmul.mubr.f32.vlgmr.msra.gmra.mxu0 %v3547_v54  ;;  %2335 = vmatmul.mubr.f32.vlgmr.msra.gmra.mxu1 %v3547_v54 }
 0x720   :  { %2369 = vmatprep.mubr.msk.f32.mxu0 %vm2584_vm2, %v3633_v47  ;;  %2338 = vmatpush3.msra.mxu0 %v1749_v5 }
 0x721   :  { %2339 = vmatprep.subr.mxu0 %v3633_v47 }
 0x722   :  { %2340 = vmatpush3.msra.mxu0 %v1748_v55 }
 0x723   :  { %2341 = vmatprep.subr.mxu0 %v3633_v47 }
 0x724   :  { %2342 = vmatpush3.msra.mxu0 %v1747_v7 }
 0x725   :  { %2343 = vmatprep.subr.mxu0 %v3633_v47 }
 0x726   :  { %2344 = vmatpush3.msra.mxu0 %v1746_v56 }
 0x727   :  { %2345 = vmatprep.subr.mxu0 %v3633_v47 }
 0x728   :  { %2346 = vmatpush3.msra.mxu0 %v1745_v9 }
 0x729   :  { %2347 = vmatprep.subr.mxu0 %v3633_v47 }
 0x72a   :  { %2348 = vmatpush3.msra.mxu0 %v1744_v38 }
 0x72b   :  { %2349 = vmatprep.subr.mxu0 %v3633_v47 }
 0x72c   :  { %2350 = vmatpush3.msra.mxu0 %v1743_v39 }
 0x72d   :  { %2351 = vmatprep.subr.mxu0 %v3633_v47 }
 0x72e   :  { %2352 = vmatpush3.msra.mxu0 %v1742_v40 }
 0x72f   :  { %2353 = vmatprep.subr.mxu0 %v3633_v47 }
 0x730   :  { %2354 = vmatpush3.msra.mxu0 %v1741_v41 }
 0x731   :  { %2355 = vmatprep.subr.mxu0 %v3633_v47 }
 0x732   :  { %2356 = vmatpush3.msra.mxu0 %v1740_v57 }
 0x733   :  { %2357 = vmatprep.subr.mxu0 %v3633_v47 }
 0x734   :  { %2358 = vmatpush3.msra.mxu0 %v1739_v6 }
 0x735   :  { %2359 = vmatprep.subr.mxu0 %v3633_v47 }
 0x736   :  { %2360 = vmatpush3.msra.mxu0 %v1738_v12 }
 0x737   :  { %2361 = vmatprep.subr.mxu0 %v3633_v47 }
 0x738   :  { %2362 = vmatpush3.msra.mxu0 %v1737_v14 }
 0x739   :  { %2363 = vmatprep.subr.mxu0 %v3633_v47 }
 0x73a   :  { %2364 = vmatpush3.msra.mxu0 %v1736_v15 }
 0x73b   :  { %2365 = vmatprep.subr.mxu0 %v3633_v47 }
 0x73c   :  { %2366 = vmatpush3.msra.mxu0 %v1735_v16 }
 0x73d   :  { %2367 = vmatprep.subr.mxu0 %v3633_v47 }
 0x73e   :  { %2368 = vmatpush3.msra.mxu0 %v1734_v18 }
 0x7df   :  { %v1638_v20 = vpop.f32.mrf.mxu0  ;;  %v1709_v21 = vpop.f32.mrf.mxu1 }
 0x7e0   :  { %v1713_v10 = vadd.f32 %v1638_v20, %v3678_v22  ;;  %v1727_v25 = vadd.f32 %v3542_v58, %v1709_v21 }
 0x7e1   :  { %v2336_v29 = vpop.f32.mrf.mxu1  ;;  %v1640_v32 = vpop.f32.mrf.mxu0 }
 0x7e2   :  { %v1878_v31 = vmul.f32 -1.442695, %v1713_v10  ;;  %v1720_v34 = vadd.f32 %v1640_v32, %v3679_v33 }
 0x7e4   :  { %2452 = vpow2.f32 %v1878_v31  ;;  %v1879_v35 = vmul.f32 -1.442695, %v1720_v34 }
 0x7e6   :  { %2454 = vpow2.f32 %v1879_v35 }
 0x7f1   :  { %v2453_v37 = vpop.eup %2452 }
 0x7f2   :  { %v1717_v11 = vadd.f32 1.0, %v2453_v37 }
 0x7f3   :  { %v2455_v23 = vpop.eup %2454 }
 0x7f4   :  { %2456 = vrcp.f32 %v1717_v11  ;;  %v1724_v3 = vadd.f32 1.0, %v2455_v23 }
 0x801   :  { %v2457_v47 = vpop.eup %2456 }
 0x802   :  { %v1728_v26 = vmul.f32 %v2457_v47, %v1727_v25 }
 0x804   :  { %v1729_v28 = vadd.f32 %v1728_v26, %v3680_v27 }
 0x806   :  { %2458 = vtanh.f32 %v1729_v28 }
 0x807   :  { %2460 = vrcp.f32 %v1724_v3 }
 0x813   :  { %v2459_v43 = vpop.eup %2458 }
 0x814   :  { %v1731_v30 = vsub.f32 %v3547_v54, %v2459_v43  ;;  %v2461_v44 = vpop.eup %2460 }
 0x816   :  { %v1732_v63 = vmul.f32 %v2461_v44, %v1731_v30 }
 0x818   :  { %v1733_v42 = vadd.f32 %v2459_v43, %v1732_v63 }
 0x81a   :  { %2370 = vmatmul.mubr.f32.vlgmr.msra.gmra.mxu0 %v1733_v42 }
 0x8da   :  { %v1823_v1 = vpop.f32.mrf.mxu0 }
 0x8db   :  { %v1824_v24 = vadd.f32 %v1880_v60, %v1823_v1 }
 0x8dc   :  { %v2371_v19 = vpop.f32.mrf.mxu0 }
 0x8dd   :  { %1827 = vst [vmem:[#allocation8] sm:$0xff] %v1824_v24 }
 0x8de   :  { %2562 = shalt.err (!%p2559_p0)
}
 0x8df   :  { %1837 = dma.vmem_to_hbm [thread:$0]  %s1835_s2, 128, %s3586_s7, [#allocation5]  }
 0x8e0   :  { %2575 = dma.done.wait [#allocation5], 128  }
 0x8e1   :  { %2576 = vsyncadd [#allocation5], 4294967168 }
 0x8e2   :  { %1841 = vsyncpa [#allocation4], 1 }
 0x8e3   :  { %1842 = vsyncpa [#allocation7], 1 }
 0x8e4   :  { %1843 = vsyncpa [#allocation5], 1 }

</bundles_post_ra>
